<compile_context>
chip_gen: v7x
topology: tpu7x:2x2x1
jax: 0.10.0
libtpu: 0.0.40
codegen_flags: <defaults>
</compile_context>

<pallas_src>
import jax
import jax.numpy as jnp
from jax.experimental import pallas as pl
from jax.experimental.pallas import tpu as pltpu

# ---------------- configuration (small, self-consistent shapes) ----------------
B = 2
SEQ_LEN = 8          # also the number of graph nodes (GCN reshape requires this)
PRED_LEN = 8
ENC_IN = 16          # GCN feature_dim == enc_in
PATCH_LEN = 4
D_MODEL = 32


# -------------------------------- Pallas kernel ---------------------------------
def segrnn_fused_kernel(x_ref, wenc_ref, wgru_ref, wihblk_ref, wtail_ref,
                        bias_ref, gidec_ref, o_ref):
    """Entire Segrnn forward, batch folded, transposed layout (units in lanes)."""
    L, BC = x_ref.shape                    # time steps, batch*enc_in
    d = wgru_ref.shape[1]                  # d_model
    d3 = 3 * d
    W = wgru_ref.shape[0] - d3             # patch_len
    N = L // W                             # encoder patches
    B_ = o_ref.shape[0]                    # batch
    C = BC // B_                           # enc_in
    U = 2 * BC                             # GRU "units" = B * 2*enc_in (lanes)
    M = gidec_ref.shape[1] // U            # decoder patches

    # ---- unpack the bundled operands (static sublane slices, free) -------------
    lap = wenc_ref[0:L, :]                                 # (L, L)
    wpblk = wenc_ref[L:, :]                                # (N*d, L)   blockdiag(linear_patch^T)
    w_hh = wgru_ref[0:d3, :]                               # (3d, d)
    wre = wgru_ref[d3:, :]                                 # (W, d)     linear_patch_re weight
    wihblk = wihblk_ref[...]                               # (N*3d, N*d) blockdiag(W_ih^T)
    w1big = wtail_ref[0:M * U, :]                          # (M*U, M*B*C) blockdiag linear1
    w1sl = wtail_ref[M * U:M * U + U, :]                   # (U,   M*B*C) linear1 for seq_last
    constf = wtail_ref[M * U + U:, :]                      # (W,   M*B*C) bre@w1 + b1
    bp_s = bias_ref[0:N * d, :]                            # (N*d, 1)
    bi_s = bias_ref[N * d:N * d + N * d3, :]               # (N*3d, 1)
    b_h = bias_ref[N * d + N * d3:, :]                     # (3d, 1)

    # ---- GCN head + feature concat (unit order: [GCN channels | raw channels]) --
    x_t = x_ref[...]                                       # (L, B*C), time-major
    w_t = jnp.dot(lap, x_t, preferred_element_type=jnp.float32)        # (L, B*C)
    x_cat = jnp.concatenate([w_t, x_t], axis=1)            # (L, U)
    seq_last = x_cat[L - 1:L, :]                           # (1, U)  free sublane slice
    x_det = x_cat - seq_last                               # (L, U)

    # ---- patching + linear_patch + ReLU + GRU input projection, all hoisted -----
    # block-diagonal weights fold the N patch offsets into a single contraction.
    enc_stack = jnp.maximum(
        jnp.dot(wpblk, x_det, preferred_element_type=jnp.float32) + bp_s, 0.0)   # (N*d, U)
    gi_stack = jnp.dot(wihblk, enc_stack,
                       preferred_element_type=jnp.float32) + bi_s                # (N*3d, U)

    def gru_gates(gi, gh, h_prev):
        # PyTorch GRU cell, gate order (r, z, n); b_hn stays inside the r* term.
        r = jax.nn.sigmoid(gi[0:d, :] + gh[0:d, :])
        z = jax.nn.sigmoid(gi[d:2 * d, :] + gh[d:2 * d, :])
        n = jnp.tanh(gi[2 * d:, :] + r * gh[2 * d:, :])
        return (1.0 - z) * n + z * h_prev

    # ---- encoder GRU recurrence: only W_hh @ h is serial; t=0 skips the matmul ---
    h = gru_gates(gi_stack[0:d3, :], b_h, 0.0)             # (d, U)
    for t in range(1, N):
        gh = jnp.dot(w_hh, h, preferred_element_type=jnp.float32) + b_h
        h = gru_gates(gi_stack[t * d3:(t + 1) * d3, :], gh, h)

    # ---- decoder: all M patches share h -> one batched GRU step -----------------
    # gi for the decoder is parameter-only and precomputed in the wrapper.
    h_rep = jnp.concatenate([h] * M, axis=1)               # (d, M*U), m-major lanes
    gh_d = jnp.dot(w_hh, h_rep, preferred_element_type=jnp.float32) + b_h   # (3d, M*U)
    h_dec = gru_gates(gidec_ref[...], gh_d, h_rep)         # (d, M*U)
    # TODO(synk): nn.Dropout(0.5) on dec_out is identity here (inference mode).

    # ---- tail: apply linear1 FIRST (block weight), then linear_patch_re ---------
    zt = jnp.dot(h_dec, w1big, preferred_element_type=jnp.float32)      # (d, M*B*C)
    f = jnp.dot(wre, zt, preferred_element_type=jnp.float32)            # (W, M*B*C)
    slcorr = jnp.dot(seq_last, w1sl, preferred_element_type=jnp.float32)  # (1, M*B*C)
    f = f + constf + slcorr                                              # (W, M*B*C)

    # ---- assemble the lane-dense (B, pred_len*enc_in) output --------------------
    rows = []
    for b in range(B_):
        pieces = []
        for m in range(M):
            for w in range(W):
                pieces.append(f[w:w + 1, m * BC + b * C:m * BC + (b + 1) * C])
        rows.append(jnp.concatenate(pieces, axis=1))       # (1, pred_len*C)
    o_ref[...] = jnp.concatenate(rows, axis=0)             # (B, pred_len*C)


# ------------------------------ plain-JAX glue ----------------------------------
def calculate_laplacian_with_self_loop(matrix):
    matrix = matrix + jnp.eye(matrix.shape[0], dtype=matrix.dtype)
    row_sum = matrix.sum(1)
    d_inv_sqrt = jnp.power(row_sum, -0.5)
    d_inv_sqrt = jnp.where(jnp.isinf(d_inv_sqrt), 0.0, d_inv_sqrt)
    d_mat = jnp.diag(d_inv_sqrt)
    return (matrix @ d_mat).T @ d_mat


def make_adj(n):
    # Deterministic ring adjacency (stand-in for the .npy file in the source).
    idx = jnp.arange(n)
    a = jnp.zeros((n, n), jnp.float32)
    a = a.at[idx, (idx + 1) % n].set(1.0)
    a = a.at[(idx + 1) % n, idx].set(1.0)
    return a


def init_params(key):
    d, w, c = D_MODEL, PATCH_LEN, ENC_IN
    m = PRED_LEN // PATCH_LEN
    ks = jax.random.split(key, 20)

    def rnd(i, shape, scale=0.1):
        return (scale * jax.random.normal(ks[i], shape)).astype(jnp.float32)

    return {
        # linear_patch: torch Linear(patch_len, d_model), stored transposed (W, d)
        "wp_t": rnd(0, (w, d)), "bp": rnd(1, (1, d)),
        # GRU(input=d, hidden=d), per-gate, stored transposed (d, d)
        "wir_t": rnd(2, (d, d)), "wiz_t": rnd(3, (d, d)), "win_t": rnd(4, (d, d)),
        "whr_t": rnd(5, (d, d)), "whz_t": rnd(6, (d, d)), "whn_t": rnd(7, (d, d)),
        "bir": rnd(8, (1, d)), "biz": rnd(9, (1, d)), "bin": rnd(10, (1, d)),
        "bhr": rnd(11, (1, d)), "bhz": rnd(12, (1, d)), "bhn": rnd(13, (1, d)),
        # linear_patch_re: Linear(d_model, patch_len), transposed (d, W)
        "wre_t": rnd(14, (d, w)), "bre": rnd(15, (1, w)),
        # embeddings
        "pos_emb": rnd(16, (m, d // 2), 1.0),
        "channel_emb": rnd(17, (c, d // 2), 1.0),
        # linear1: Linear(2*enc_in, enc_in), transposed (2C, C)
        "w1_t": rnd(18, (2 * c, c)), "b1": rnd(19, (1, c)),
    }


def segrnn_forward(params, lap, x):
    B_, L, C = x.shape
    W, d = PATCH_LEN, D_MODEL
    N, M = L // W, PRED_LEN // W
    C2, d3 = 2 * C, 3 * d
    BC, BC2 = B_ * C, B_ * C2

    # ---- parameter packing / constant folding (XLA-side, outside the kernel) ----
    w_ih_T = jnp.concatenate([params["wir_t"].T, params["wiz_t"].T, params["win_t"].T], axis=0)
    w_hh_T = jnp.concatenate([params["whr_t"].T, params["whz_t"].T, params["whn_t"].T], axis=0)
    b_i = jnp.concatenate([params["bir"], params["biz"], params["bin"]], axis=1)      # (1, 3d)
    b_h_col = jnp.concatenate([params["bhr"], params["bhz"], params["bhn"]], axis=1).reshape(d3, 1)

    wpblk = jax.scipy.linalg.block_diag(*([params["wp_t"].T] * N))       # (N*d, L)
    bp_stack = jnp.tile(params["bp"].reshape(d, 1), (N, 1))              # (N*d, 1)
    wihblk = jax.scipy.linalg.block_diag(*([w_ih_T] * N))                # (N*3d, N*d)
    bi_stack = jnp.tile(b_i.reshape(d3, 1), (N, 1))                      # (N*3d, 1)

    # kernel unit order u: [GCN channels (k=0) | raw channels (k=1)], u = k*BC + b*C + c
    u = jnp.arange(BC2)
    k_idx, b_idx, c_idx = u // BC, (u % BC) // C, u % C
    c2_idx = k_idx * C + c_idx

    # decoder constant-input gate projection gi_dec (3d, M*BC2), lanes m-major.
    # TODO(synk): reference channel_emb has enc_in rows while the working tensor has
    #             2*enc_in channels (shape bug in the source); tiled 2x here.
    ch_full = jnp.concatenate([params["channel_emb"], params["channel_emb"]], axis=0)  # (2C, d/2)
    ch_cols = ch_full[c2_idx]                                            # (BC2, d/2)
    w_ih_row = jnp.concatenate([params["wir_t"], params["wiz_t"], params["win_t"]], axis=1)
    dec_rows = []
    for m in range(M):
        pos = jnp.broadcast_to(params["pos_emb"][m][None, :], (BC2, d // 2))
        dec_rows.append(jnp.concatenate([pos, ch_cols], axis=1))         # (BC2, d)
    dec_in = jnp.concatenate(dec_rows, axis=0)                           # (M*BC2, d)
    gi_dec_T = (dec_in @ w_ih_row + b_i).T                               # (3d, M*BC2)

    # tail weights: apply linear1 first (block weight), fold biases/seq_last corrections
    wre_T = params["wre_t"].T                                            # (W, d)
    rows_w1 = params["w1_t"][c2_idx]                                     # (BC2, C)
    onehot_b = jax.nn.one_hot(b_idx, B_, dtype=jnp.float32)              # (BC2, B)
    blk = (onehot_b[:, :, None] * rows_w1[:, None, :]).reshape(BC2, BC)  # (BC2, B*C)
    w1big = jax.scipy.linalg.block_diag(*([blk] * M))                    # (M*BC2, M*BC)
    w1sl = jnp.tile(blk, (1, M))                                         # (BC2,  M*BC)
    colsum_w1 = params["w1_t"].sum(axis=0)                               # (C,)
    const_f = jnp.tile(params["bre"].reshape(W, 1) * colsum_w1[None, :]
                       + params["b1"].reshape(1, C), (1, M * B_))        # (W, M*BC)

    # operand packing by lane width: 7 DMA descriptors total
    wpack_enc = jnp.concatenate([lap, wpblk], axis=0)                    # (L + N*d, L)
    wpack_gru = jnp.concatenate([w_hh_T, wre_T], axis=0)                 # (3d + W, d)
    wpack_tail = jnp.concatenate([w1big, w1sl, const_f], axis=0)         # (M*BC2+BC2+W, M*BC)
    bias_pack = jnp.concatenate([bp_stack, bi_stack, b_h_col], axis=0)   # (N*d+N*3d+3d, 1)

    # data: time-major, columns (b, c) -- exactly the GCN's (num_nodes, B*feature) layout
    x_t = jnp.transpose(x, (1, 0, 2)).reshape(L, BC)                     # (L, B*C)

    out_flat = pl.pallas_call(
        segrnn_fused_kernel,
        out_shape=jax.ShapeDtypeStruct((B_, PRED_LEN * C), jnp.float32),
        grid=(1,),
        in_specs=[
            pl.BlockSpec(x_t.shape, lambda i: (0, 0)),
            pl.BlockSpec(wpack_enc.shape, lambda i: (0, 0)),
            pl.BlockSpec(wpack_gru.shape, lambda i: (0, 0)),
            pl.BlockSpec(wihblk.shape, lambda i: (0, 0)),
            pl.BlockSpec(wpack_tail.shape, lambda i: (0, 0)),
            pl.BlockSpec(bias_pack.shape, lambda i: (0, 0)),
            pl.BlockSpec(gi_dec_T.shape, lambda i: (0, 0)),
        ],
        out_specs=pl.BlockSpec((B_, PRED_LEN * C), lambda i: (0, 0)),
        compiler_params=pltpu.CompilerParams(dimension_semantics=("arbitrary",)),
        cost_estimate=pl.CostEstimate(flops=3_400_000, transcendentals=25_000,
                                      bytes_accessed=170_000),
    )(x_t, wpack_enc, wpack_gru, wihblk, wpack_tail, bias_pack, gi_dec_T)

    return out_flat.reshape(B_, PRED_LEN, C)                             # free reshape


# ------------------- pure-JAX reference (mirrors the PyTorch forward) -----------
def segrnn_reference(params, lap, x):
    B_, L, C = x.shape
    W, d = PATCH_LEN, D_MODEL
    N, M = L // W, PRED_LEN // W
    C2 = 2 * C

    xt = jnp.transpose(x, (1, 0, 2)).reshape(L, B_ * C)
    w = (lap @ xt).reshape(L, B_, C).transpose(1, 0, 2)                  # GCN
    xc = jnp.concatenate([w, x], axis=-1)                                # (B, L, 2C)
    seq_last = xc[:, -1:, :]
    xd = xc - seq_last

    xw = jnp.transpose(xd, (0, 2, 1)).reshape(B_ * C2, N, W)
    enc = jax.nn.relu(xw @ params["wp_t"] + params["bp"])                # (B*2C, N, d)

    w_ih = jnp.concatenate([params["wir_t"], params["wiz_t"], params["win_t"]], axis=1)
    w_hh = jnp.concatenate([params["whr_t"], params["whz_t"], params["whn_t"]], axis=1)
    b_i = jnp.concatenate([params["bir"], params["biz"], params["bin"]], axis=1)
    b_h = jnp.concatenate([params["bhr"], params["bhz"], params["bhn"]], axis=1)

    def cell(x_rows, h_rows):
        gi = x_rows @ w_ih + b_i
        gh = h_rows @ w_hh + b_h
        r = jax.nn.sigmoid(gi[:, :d] + gh[:, :d])
        z = jax.nn.sigmoid(gi[:, d:2 * d] + gh[:, d:2 * d])
        n = jnp.tanh(gi[:, 2 * d:] + r * gh[:, 2 * d:])
        return (1.0 - z) * n + z * h_rows

    h = jnp.zeros((B_ * C2, d), jnp.float32)
    for t in range(N):
        h = cell(enc[:, t, :], h)

    ch_full = jnp.concatenate([params["channel_emb"], params["channel_emb"]], axis=0)
    pos = jnp.broadcast_to(params["pos_emb"][None, :, :], (B_ * C2, M, d // 2))
    chn = jnp.broadcast_to(jnp.tile(ch_full, (B_, 1))[:, None, :], (B_ * C2, M, d // 2))
    dec_in = jnp.concatenate([pos, chn], axis=-1).reshape(B_ * C2 * M, d)
    h_rep = jnp.repeat(h, M, axis=0)
    hd = cell(dec_in, h_rep)

    yw = hd @ params["wre_t"] + params["bre"]                            # (B*2C*M, W)
    y = yw.reshape(B_, C2, M * W).transpose(0, 2, 1)                     # (B, pred, 2C)
    y = y + seq_last
    return y @ params["w1_t"] + params["b1"]                             # (B, pred, C)


if __name__ == "__main__":
    key = jax.random.PRNGKey(0)
    k_param, k_x = jax.random.split(key)

    params = init_params(k_param)
    adj = make_adj(SEQ_LEN)
    lap = calculate_laplacian_with_self_loop(adj)
    x = jax.random.normal(k_x, (B, SEQ_LEN, ENC_IN), dtype=jnp.float32)

    fwd = jax.jit(segrnn_forward)
    y = jax.block_until_ready(fwd(params, lap, x))

    assert y.shape == (B, PRED_LEN, ENC_IN), y.shape
    assert bool(jnp.all(jnp.isfinite(y)))

    y_ref = jax.block_until_ready(jax.jit(segrnn_reference)(params, lap, x))
    err = float(jnp.max(jnp.abs(y - y_ref)))
    assert jnp.allclose(y, y_ref, rtol=1e-2, atol=1e-2), err

    print("KERNEL_OK")
</pallas_src>

<mosaic_0001>
module attributes {stable_mosaic.version = 11 : i64} {
  func.func @segrnn_fused_kernel(%arg0: i32, %arg1: memref<8x32xf32, #tpu.memory_space<vmem>>, %arg2: memref<72x8xf32, #tpu.memory_space<vmem>>, %arg3: memref<100x32xf32, #tpu.memory_space<vmem>>, %arg4: memref<192x64xf32, #tpu.memory_space<vmem>>, %arg5: memref<196x64xf32, #tpu.memory_space<vmem>>, %arg6: memref<352x1xf32, #tpu.memory_space<vmem>>, %arg7: memref<96x128xf32, #tpu.memory_space<vmem>>, %arg8: memref<2x128xf32, #tpu.memory_space<vmem>>) attributes {dimension_semantics = [#tpu.dimension_semantics<arbitrary>], iteration_bounds = array<i64: 1>, scalar_prefetch = 0 : i64, scratch_operands = 0 : i64, tpu.core_type = #tpu.core_type<tc>, window_params = [{pipeline_mode = #tpu.pipeline_mode<synchronous>, transform_indices = @transform_0, window_bounds = array<i64: 8, 32>}, {pipeline_mode = #tpu.pipeline_mode<synchronous>, transform_indices = @transform_1, window_bounds = array<i64: 72, 8>}, {pipeline_mode = #tpu.pipeline_mode<synchronous>, transform_indices = @transform_2, window_bounds = array<i64: 100, 32>}, {pipeline_mode = #tpu.pipeline_mode<synchronous>, transform_indices = @transform_3, window_bounds = array<i64: 192, 64>}, {pipeline_mode = #tpu.pipeline_mode<synchronous>, transform_indices = @transform_4, window_bounds = array<i64: 196, 64>}, {pipeline_mode = #tpu.pipeline_mode<synchronous>, transform_indices = @transform_5, window_bounds = array<i64: 352, 1>}, {pipeline_mode = #tpu.pipeline_mode<synchronous>, transform_indices = @transform_6, window_bounds = array<i64: 96, 128>}, {pipeline_mode = #tpu.pipeline_mode<synchronous>, transform_indices = @transform_7, window_bounds = array<i64: 2, 128>}]} {
    %c0 = arith.constant 0 : index
    %c0_0 = arith.constant 0 : index
    %0 = vector.load %arg2[%c0, %c0_0] : memref<72x8xf32, #tpu.memory_space<vmem>>, vector<8x8xf32>
    %c8 = arith.constant 8 : index
    %c0_1 = arith.constant 0 : index
    %1 = vector.load %arg2[%c8, %c0_1] : memref<72x8xf32, #tpu.memory_space<vmem>>, vector<64x8xf32>
    %c0_2 = arith.constant 0 : index
    %c0_3 = arith.constant 0 : index
    %2 = vector.load %arg3[%c0_2, %c0_3] : memref<100x32xf32, #tpu.memory_space<vmem>>, vector<96x32xf32>
    %c96 = arith.constant 96 : index
    %c0_4 = arith.constant 0 : index
    %3 = vector.load %arg3[%c96, %c0_4] : memref<100x32xf32, #tpu.memory_space<vmem>>, vector<4x32xf32>
    %c0_5 = arith.constant 0 : index
    %c0_6 = arith.constant 0 : index
    %4 = vector.load %arg4[%c0_5, %c0_6] : memref<192x64xf32, #tpu.memory_space<vmem>>, vector<192x64xf32>
    %c0_7 = arith.constant 0 : index
    %c0_8 = arith.constant 0 : index
    %5 = vector.load %arg5[%c0_7, %c0_8] : memref<196x64xf32, #tpu.memory_space<vmem>>, vector<128x64xf32>
    %c128 = arith.constant 128 : index
    %c0_9 = arith.constant 0 : index
    %6 = vector.load %arg5[%c128, %c0_9] : memref<196x64xf32, #tpu.memory_space<vmem>>, vector<64x64xf32>
    %c192 = arith.constant 192 : index
    %c0_10 = arith.constant 0 : index
    %7 = vector.load %arg5[%c192, %c0_10] : memref<196x64xf32, #tpu.memory_space<vmem>>, vector<4x64xf32>
    %c0_11 = arith.constant 0 : index
    %c0_12 = arith.constant 0 : index
    %8 = vector.load %arg6[%c0_11, %c0_12] : memref<352x1xf32, #tpu.memory_space<vmem>>, vector<64x1xf32>
    %c64 = arith.constant 64 : index
    %c0_13 = arith.constant 0 : index
    %9 = vector.load %arg6[%c64, %c0_13] : memref<352x1xf32, #tpu.memory_space<vmem>>, vector<192x1xf32>
    %c256 = arith.constant 256 : index
    %c0_14 = arith.constant 0 : index
    %10 = vector.load %arg6[%c256, %c0_14] : memref<352x1xf32, #tpu.memory_space<vmem>>, vector<96x1xf32>
    %c0_15 = arith.constant 0 : index
    %c0_16 = arith.constant 0 : index
    %11 = vector.load %arg1[%c0_15, %c0_16] : memref<8x32xf32, #tpu.memory_space<vmem>>, vector<8x32xf32>
    %cst = arith.constant dense<0.000000e+00> : vector<8x32xf32>
    %12 = tpu.matmul %0, %11, %cst {dimension_numbers = #tpu.dot_dimension_numbers<[1], [0], [0], [1], [0, 0, 1, 1], [], []>} : vector<8x8xf32>, vector<8x32xf32>, vector<8x32xf32> -> vector<8x32xf32>
    %13 = tpu.concatenate %12, %11 in 1 : vector<8x32xf32>, vector<8x32xf32> -> vector<8x64xf32>
    %14 = vector.extract_strided_slice %13 {offsets = [7, 0], sizes = [1, 64], strides = [1, 1]} : vector<8x64xf32> to vector<1x64xf32>
    %15 = vector.broadcast %14 : vector<1x64xf32> to vector<8x64xf32>
    %16 = arith.subf %13, %15 : vector<8x64xf32>
    %cst_17 = arith.constant dense<0.000000e+00> : vector<64x64xf32>
    %17 = tpu.matmul %1, %16, %cst_17 {dimension_numbers = #tpu.dot_dimension_numbers<[1], [0], [0], [1], [0, 0, 1, 1], [], []>} : vector<64x8xf32>, vector<8x64xf32>, vector<64x64xf32> -> vector<64x64xf32>
    %18 = vector.broadcast %8 : vector<64x1xf32> to vector<64x64xf32>
    %19 = arith.addf %17, %18 : vector<64x64xf32>
    %cst_18 = arith.constant 0.000000e+00 : f32
    %20 = vector.broadcast %cst_18 : f32 to vector<64x64xf32>
    %21 = arith.maximumf %19, %20 : vector<64x64xf32>
    %cst_19 = arith.constant dense<0.000000e+00> : vector<192x64xf32>
    %22 = tpu.matmul %4, %21, %cst_19 {dimension_numbers = #tpu.dot_dimension_numbers<[1], [0], [0], [1], [0, 0, 1, 1], [], []>} : vector<192x64xf32>, vector<64x64xf32>, vector<192x64xf32> -> vector<192x64xf32>
    %23 = vector.broadcast %9 : vector<192x1xf32> to vector<192x64xf32>
    %24 = arith.addf %22, %23 : vector<192x64xf32>
    %25 = vector.extract_strided_slice %24 {offsets = [0, 0], sizes = [96, 64], strides = [1, 1]} : vector<192x64xf32> to vector<96x64xf32>
    %26 = vector.extract_strided_slice %25 {offsets = [0, 0], sizes = [32, 64], strides = [1, 1]} : vector<96x64xf32> to vector<32x64xf32>
    %27 = vector.extract_strided_slice %10 {offsets = [0, 0], sizes = [32, 1], strides = [1, 1]} : vector<96x1xf32> to vector<32x1xf32>
    %28 = vector.broadcast %27 : vector<32x1xf32> to vector<32x64xf32>
    %29 = arith.addf %26, %28 : vector<32x64xf32>
    %30 = arith.negf %29 : vector<32x64xf32>
    %31 = math.exp %30 : vector<32x64xf32>
    %cst_20 = arith.constant 1.000000e+00 : f32
    %32 = vector.broadcast %cst_20 : f32 to vector<32x64xf32>
    %33 = arith.addf %32, %31 : vector<32x64xf32>
    %34 = arith.divf %32, %33 : vector<32x64xf32>
    %35 = vector.extract_strided_slice %25 {offsets = [32, 0], sizes = [32, 64], strides = [1, 1]} : vector<96x64xf32> to vector<32x64xf32>
    %36 = vector.extract_strided_slice %10 {offsets = [32, 0], sizes = [32, 1], strides = [1, 1]} : vector<96x1xf32> to vector<32x1xf32>
    %37 = vector.broadcast %36 : vector<32x1xf32> to vector<32x64xf32>
    %38 = arith.addf %35, %37 : vector<32x64xf32>
    %39 = arith.negf %38 : vector<32x64xf32>
    %40 = math.exp %39 : vector<32x64xf32>
    %cst_21 = arith.constant 1.000000e+00 : f32
    %41 = vector.broadcast %cst_21 : f32 to vector<32x64xf32>
    %42 = arith.addf %41, %40 : vector<32x64xf32>
    %43 = arith.divf %41, %42 : vector<32x64xf32>
    %44 = vector.extract_strided_slice %25 {offsets = [64, 0], sizes = [32, 64], strides = [1, 1]} : vector<96x64xf32> to vector<32x64xf32>
    %45 = vector.extract_strided_slice %10 {offsets = [64, 0], sizes = [32, 1], strides = [1, 1]} : vector<96x1xf32> to vector<32x1xf32>
    %46 = vector.broadcast %45 : vector<32x1xf32> to vector<32x64xf32>
    %47 = arith.mulf %34, %46 : vector<32x64xf32>
    %48 = arith.addf %44, %47 : vector<32x64xf32>
    %49 = math.tanh %48 : vector<32x64xf32>
    %cst_22 = arith.constant 1.000000e+00 : f32
    %50 = vector.broadcast %cst_22 : f32 to vector<32x64xf32>
    %51 = arith.subf %50, %43 : vector<32x64xf32>
    %52 = arith.mulf %51, %49 : vector<32x64xf32>
    %cst_23 = arith.constant 0.000000e+00 : f32
    %53 = vector.broadcast %cst_23 : f32 to vector<32x64xf32>
    %54 = arith.mulf %43, %53 : vector<32x64xf32>
    %55 = arith.addf %52, %54 : vector<32x64xf32>
    %cst_24 = arith.constant dense<0.000000e+00> : vector<96x64xf32>
    %56 = tpu.matmul %2, %55, %cst_24 {dimension_numbers = #tpu.dot_dimension_numbers<[1], [0], [0], [1], [0, 0, 1, 1], [], []>} : vector<96x32xf32>, vector<32x64xf32>, vector<96x64xf32> -> vector<96x64xf32>
    %57 = vector.broadcast %10 : vector<96x1xf32> to vector<96x64xf32>
    %58 = arith.addf %56, %57 : vector<96x64xf32>
    %59 = vector.extract_strided_slice %24 {offsets = [96, 0], sizes = [96, 64], strides = [1, 1]} : vector<192x64xf32> to vector<96x64xf32>
    %60 = vector.extract_strided_slice %59 {offsets = [0, 0], sizes = [32, 64], strides = [1, 1]} : vector<96x64xf32> to vector<32x64xf32>
    %61 = vector.extract_strided_slice %58 {offsets = [0, 0], sizes = [32, 64], strides = [1, 1]} : vector<96x64xf32> to vector<32x64xf32>
    %62 = arith.addf %60, %61 : vector<32x64xf32>
    %63 = arith.negf %62 : vector<32x64xf32>
    %64 = math.exp %63 : vector<32x64xf32>
    %cst_25 = arith.constant 1.000000e+00 : f32
    %65 = vector.broadcast %cst_25 : f32 to vector<32x64xf32>
    %66 = arith.addf %65, %64 : vector<32x64xf32>
    %67 = arith.divf %65, %66 : vector<32x64xf32>
    %68 = vector.extract_strided_slice %59 {offsets = [32, 0], sizes = [32, 64], strides = [1, 1]} : vector<96x64xf32> to vector<32x64xf32>
    %69 = vector.extract_strided_slice %58 {offsets = [32, 0], sizes = [32, 64], strides = [1, 1]} : vector<96x64xf32> to vector<32x64xf32>
    %70 = arith.addf %68, %69 : vector<32x64xf32>
    %71 = arith.negf %70 : vector<32x64xf32>
    %72 = math.exp %71 : vector<32x64xf32>
    %cst_26 = arith.constant 1.000000e+00 : f32
    %73 = vector.broadcast %cst_26 : f32 to vector<32x64xf32>
    %74 = arith.addf %73, %72 : vector<32x64xf32>
    %75 = arith.divf %73, %74 : vector<32x64xf32>
    %76 = vector.extract_strided_slice %59 {offsets = [64, 0], sizes = [32, 64], strides = [1, 1]} : vector<96x64xf32> to vector<32x64xf32>
    %77 = vector.extract_strided_slice %58 {offsets = [64, 0], sizes = [32, 64], strides = [1, 1]} : vector<96x64xf32> to vector<32x64xf32>
    %78 = arith.mulf %67, %77 : vector<32x64xf32>
    %79 = arith.addf %76, %78 : vector<32x64xf32>
    %80 = math.tanh %79 : vector<32x64xf32>
    %cst_27 = arith.constant 1.000000e+00 : f32
    %81 = vector.broadcast %cst_27 : f32 to vector<32x64xf32>
    %82 = arith.subf %81, %75 : vector<32x64xf32>
    %83 = arith.mulf %82, %80 : vector<32x64xf32>
    %84 = arith.mulf %75, %55 : vector<32x64xf32>
    %85 = arith.addf %83, %84 : vector<32x64xf32>
    %86 = tpu.concatenate %85, %85 in 1 : vector<32x64xf32>, vector<32x64xf32> -> vector<32x128xf32>
    %cst_28 = arith.constant dense<0.000000e+00> : vector<96x128xf32>
    %87 = tpu.matmul %2, %86, %cst_28 {dimension_numbers = #tpu.dot_dimension_numbers<[1], [0], [0], [1], [0, 0, 1, 1], [], []>} : vector<96x32xf32>, vector<32x128xf32>, vector<96x128xf32> -> vector<96x128xf32>
    %88 = vector.broadcast %10 : vector<96x1xf32> to vector<96x128xf32>
    %89 = arith.addf %87, %88 : vector<96x128xf32>
    %c0_29 = arith.constant 0 : index
    %c0_30 = arith.constant 0 : index
    %90 = vector.load %arg7[%c0_29, %c0_30] : memref<96x128xf32, #tpu.memory_space<vmem>>, vector<96x128xf32>
    %91 = vector.extract_strided_slice %90 {offsets = [0, 0], sizes = [32, 128], strides = [1, 1]} : vector<96x128xf32> to vector<32x128xf32>
    %92 = vector.extract_strided_slice %89 {offsets = [0, 0], sizes = [32, 128], strides = [1, 1]} : vector<96x128xf32> to vector<32x128xf32>
    %93 = arith.addf %91, %92 : vector<32x128xf32>
    %94 = arith.negf %93 : vector<32x128xf32>
    %95 = math.exp %94 : vector<32x128xf32>
    %cst_31 = arith.constant 1.000000e+00 : f32
    %96 = vector.broadcast %cst_31 : f32 to vector<32x128xf32>
    %97 = arith.addf %96, %95 : vector<32x128xf32>
    %98 = arith.divf %96, %97 : vector<32x128xf32>
    %99 = vector.extract_strided_slice %90 {offsets = [32, 0], sizes = [32, 128], strides = [1, 1]} : vector<96x128xf32> to vector<32x128xf32>
    %100 = vector.extract_strided_slice %89 {offsets = [32, 0], sizes = [32, 128], strides = [1, 1]} : vector<96x128xf32> to vector<32x128xf32>
    %101 = arith.addf %99, %100 : vector<32x128xf32>
    %102 = arith.negf %101 : vector<32x128xf32>
    %103 = math.exp %102 : vector<32x128xf32>
    %cst_32 = arith.constant 1.000000e+00 : f32
    %104 = vector.broadcast %cst_32 : f32 to vector<32x128xf32>
    %105 = arith.addf %104, %103 : vector<32x128xf32>
    %106 = arith.divf %104, %105 : vector<32x128xf32>
    %107 = vector.extract_strided_slice %90 {offsets = [64, 0], sizes = [32, 128], strides = [1, 1]} : vector<96x128xf32> to vector<32x128xf32>
    %108 = vector.extract_strided_slice %89 {offsets = [64, 0], sizes = [32, 128], strides = [1, 1]} : vector<96x128xf32> to vector<32x128xf32>
    %109 = arith.mulf %98, %108 : vector<32x128xf32>
    %110 = arith.addf %107, %109 : vector<32x128xf32>
    %111 = math.tanh %110 : vector<32x128xf32>
    %cst_33 = arith.constant 1.000000e+00 : f32
    %112 = vector.broadcast %cst_33 : f32 to vector<32x128xf32>
    %113 = arith.subf %112, %106 : vector<32x128xf32>
    %114 = arith.mulf %113, %111 : vector<32x128xf32>
    %115 = arith.mulf %106, %86 : vector<32x128xf32>
    %116 = arith.addf %114, %115 : vector<32x128xf32>
    %cst_34 = arith.constant dense<0.000000e+00> : vector<32x64xf32>
    %117 = tpu.matmul %116, %5, %cst_34 {dimension_numbers = #tpu.dot_dimension_numbers<[1], [0], [0], [1], [0, 0, 1, 1], [], []>} : vector<32x128xf32>, vector<128x64xf32>, vector<32x64xf32> -> vector<32x64xf32>
    %cst_35 = arith.constant dense<0.000000e+00> : vector<4x64xf32>
    %118 = tpu.matmul %3, %117, %cst_35 {dimension_numbers = #tpu.dot_dimension_numbers<[1], [0], [0], [1], [0, 0, 1, 1], [], []>} : vector<4x32xf32>, vector<32x64xf32>, vector<4x64xf32> -> vector<4x64xf32>
    %cst_36 = arith.constant dense<0.000000e+00> : vector<1x64xf32>
    %119 = tpu.matmul %14, %6, %cst_36 {dimension_numbers = #tpu.dot_dimension_numbers<[1], [0], [0], [1], [0, 0, 1, 1], [], []>} : vector<1x64xf32>, vector<64x64xf32>, vector<1x64xf32> -> vector<1x64xf32>
    %120 = arith.addf %118, %7 : vector<4x64xf32>
    %121 = vector.broadcast %119 : vector<1x64xf32> to vector<4x64xf32>
    %122 = arith.addf %120, %121 : vector<4x64xf32>
    %123 = vector.extract_strided_slice %122 {offsets = [0, 0], sizes = [1, 16], strides = [1, 1]} : vector<4x64xf32> to vector<1x16xf32>
    %124 = vector.extract_strided_slice %122 {offsets = [1, 0], sizes = [1, 16], strides = [1, 1]} : vector<4x64xf32> to vector<1x16xf32>
    %125 = vector.extract_strided_slice %122 {offsets = [2, 0], sizes = [1, 16], strides = [1, 1]} : vector<4x64xf32> to vector<1x16xf32>
    %126 = vector.extract_strided_slice %122 {offsets = [3, 0], sizes = [1, 16], strides = [1, 1]} : vector<4x64xf32> to vector<1x16xf32>
    %127 = vector.extract_strided_slice %122 {offsets = [0, 32], sizes = [1, 16], strides = [1, 1]} : vector<4x64xf32> to vector<1x16xf32>
    %128 = vector.extract_strided_slice %122 {offsets = [1, 32], sizes = [1, 16], strides = [1, 1]} : vector<4x64xf32> to vector<1x16xf32>
    %129 = vector.extract_strided_slice %122 {offsets = [2, 32], sizes = [1, 16], strides = [1, 1]} : vector<4x64xf32> to vector<1x16xf32>
    %130 = vector.extract_strided_slice %122 {offsets = [3, 32], sizes = [1, 16], strides = [1, 1]} : vector<4x64xf32> to vector<1x16xf32>
    %131 = tpu.concatenate %123, %124, %125, %126, %127, %128, %129, %130 in 1 : vector<1x16xf32>, vector<1x16xf32>, vector<1x16xf32>, vector<1x16xf32>, vector<1x16xf32>, vector<1x16xf32>, vector<1x16xf32>, vector<1x16xf32> -> vector<1x128xf32>
    %132 = vector.extract_strided_slice %122 {offsets = [0, 16], sizes = [1, 16], strides = [1, 1]} : vector<4x64xf32> to vector<1x16xf32>
    %133 = vector.extract_strided_slice %122 {offsets = [1, 16], sizes = [1, 16], strides = [1, 1]} : vector<4x64xf32> to vector<1x16xf32>
    %134 = vector.extract_strided_slice %122 {offsets = [2, 16], sizes = [1, 16], strides = [1, 1]} : vector<4x64xf32> to vector<1x16xf32>
    %135 = vector.extract_strided_slice %122 {offsets = [3, 16], sizes = [1, 16], strides = [1, 1]} : vector<4x64xf32> to vector<1x16xf32>
    %136 = vector.extract_strided_slice %122 {offsets = [0, 48], sizes = [1, 16], strides = [1, 1]} : vector<4x64xf32> to vector<1x16xf32>
    %137 = vector.extract_strided_slice %122 {offsets = [1, 48], sizes = [1, 16], strides = [1, 1]} : vector<4x64xf32> to vector<1x16xf32>
    %138 = vector.extract_strided_slice %122 {offsets = [2, 48], sizes = [1, 16], strides = [1, 1]} : vector<4x64xf32> to vector<1x16xf32>
    %139 = vector.extract_strided_slice %122 {offsets = [3, 48], sizes = [1, 16], strides = [1, 1]} : vector<4x64xf32> to vector<1x16xf32>
    %140 = tpu.concatenate %132, %133, %134, %135, %136, %137, %138, %139 in 1 : vector<1x16xf32>, vector<1x16xf32>, vector<1x16xf32>, vector<1x16xf32>, vector<1x16xf32>, vector<1x16xf32>, vector<1x16xf32>, vector<1x16xf32> -> vector<1x128xf32>
    %141 = tpu.concatenate %131, %140 in 0 : vector<1x128xf32>, vector<1x128xf32> -> vector<2x128xf32>
    %c0_37 = arith.constant 0 : index
    %c0_38 = arith.constant 0 : index
    %142 = vector.load %arg8[%c0_37, %c0_38] : memref<2x128xf32, #tpu.memory_space<vmem>>, vector<2x128xf32>
    tpu.vector_store %arg8[%c0_37, %c0_38], %141 {strides = array<i32>} : memref<2x128xf32, #tpu.memory_space<vmem>>, vector<2x128xf32>,
    return
  }
  func.func @transform_0(%arg0: i32) -> (i32, i32) {
    %c0_i32 = arith.constant 0 : i32
    %c0_i32_0 = arith.constant 0 : i32
    %c0_i32_1 = arith.constant 0 : i32
    return %c0_i32, %c0_i32_0 : i32, i32
  }
  func.func @transform_1(%arg0: i32) -> (i32, i32) {
    %c0_i32 = arith.constant 0 : i32
    %c0_i32_0 = arith.constant 0 : i32
    %c0_i32_1 = arith.constant 0 : i32
    return %c0_i32, %c0_i32_0 : i32, i32
  }
  func.func @transform_2(%arg0: i32) -> (i32, i32) {
    %c0_i32 = arith.constant 0 : i32
    %c0_i32_0 = arith.constant 0 : i32
    %c0_i32_1 = arith.constant 0 : i32
    return %c0_i32, %c0_i32_0 : i32, i32
  }
  func.func @transform_3(%arg0: i32) -> (i32, i32) {
    %c0_i32 = arith.constant 0 : i32
    %c0_i32_0 = arith.constant 0 : i32
    %c0_i32_1 = arith.constant 0 : i32
    return %c0_i32, %c0_i32_0 : i32, i32
  }
  func.func @transform_4(%arg0: i32) -> (i32, i32) {
    %c0_i32 = arith.constant 0 : i32
    %c0_i32_0 = arith.constant 0 : i32
    %c0_i32_1 = arith.constant 0 : i32
    return %c0_i32, %c0_i32_0 : i32, i32
  }
  func.func @transform_5(%arg0: i32) -> (i32, i32) {
    %c0_i32 = arith.constant 0 : i32
    %c0_i32_0 = arith.constant 0 : i32
    %c0_i32_1 = arith.constant 0 : i32
    return %c0_i32, %c0_i32_0 : i32, i32
  }
  func.func @transform_6(%arg0: i32) -> (i32, i32) {
    %c0_i32 = arith.constant 0 : i32
    %c0_i32_0 = arith.constant 0 : i32
    %c0_i32_1 = arith.constant 0 : i32
    return %c0_i32, %c0_i32_0 : i32, i32
  }
  func.func @transform_7(%arg0: i32) -> (i32, i32) {
    %c0_i32 = arith.constant 0 : i32
    %c0_i32_0 = arith.constant 0 : i32
    %c0_i32_1 = arith.constant 0 : i32
    return %c0_i32, %c0_i32_0 : i32, i32
  }
}

</mosaic_0001>

<bundles_post_ra>
// kernel: tile.33
= control target key start
LH: loop header
LB: loop body
LE: loop exit
PB: predicated region body
PF: predicated region fallthrough
CT: control target
= control target key end

     0   :  { %vm21_vm0 = vcmask 130048   ;;  %s56_s14 = smov 16   ;;  %s57_s15 = smov 32   ;;  %vm27_vm1 = vcmask 523648   ;;  %vm33_vm2 = vcmask 392448   ;;  %vm39_vm3 = vcmask 261248   ;;  %s83_s0 = inlined_call_operand.vmem [shape: f32[4,4,16], index: 0, kind: input, shape index: {}]   ;;  %s84_s1 = inlined_call_operand.vmem [shape: f32[4,64], index: 1, kind: output, shape index: {}]  }
   0x1   :  { %v49_v0 = vld [vmem:[%s83_s0 + $0xc] sm:$0xf]  ;;  %v50_v1 = vld [vmem:[%s83_s0 + $0x8] sm:$0xf]  ;;  %v51_v2 = vld [vmem:[%s83_s0 + $0x4] sm:$0xf] }
   0x2   :  { %8 = vst [vmem:[#allocation1 + $0x18] sm:$0xf] %v49_v0  ;;  %13 = vst [vmem:[#allocation1 + $0x10] sm:$0xf] %v50_v1  ;;  %v18_v3 = vld [vmem:[%s83_s0] sm:$0xf] }
   0x3   :  { %17 = vst [vmem:[#allocation1 + $0x8] sm:$0xf] %v51_v2  ;;  %19 = vst [vmem:[#allocation1] sm:$0xf] %v18_v3  ;;  %s55_s0 = smov 48  }
   0xa   :  { %v24_v4 = vld [vmem:[#allocation1 + $0x3] ss:$8 sm:$0xf]   ;;  %v36_v5 = vld [vmem:[#allocation1 + $0x1] ss:$8 sm:$0xf]  }
   0xb   :  { %25 = vrot.lane.b32.xlu0 %v24_v4, %s55_s0  ;;  %v20_v6 = vld [vmem:[#allocation1] ss:$8 sm:$0xf]   ;;  %v30_v7 = vld [vmem:[#allocation1 + $0x2] ss:$8 sm:$0xf]   ;;  %37 = vrot.lane.b32.xlu1 %v36_v5, %s56_s14 }
   0xc   :  { %22 = vst.msk [vmem:[#allocation0] sm:$0xf] %vm21_vm0, %v20_v6  }
   0xf   :  { %31 = vrot.lane.b32.xlu0 %v30_v7, %s57_s15 }
  0x7d   :  { %v26_v8 = vpop.permute.xlu0 %25   ;;  %v38_v9 = vpop.permute.xlu1 %37  }
  0x7e   :  { %28 = vst.msk [vmem:[#allocation0] sm:$0xf] %vm27_vm1, %v26_v8  }
  0x81   :  { %v32_v10 = vpop.permute.xlu0 %31  }
  0x82   :  { %34 = vst.msk [vmem:[#allocation0] sm:$0xf] %vm33_vm2, %v32_v10  }
  0x83   :  { %40 = vst.msk [vmem:[#allocation0] sm:$0xf] %vm39_vm3, %v38_v9  }
  0x8a   :  { %v44_v11 = vld [vmem:[#allocation0] sm:$0xf] }
  0x8b   :  { %46 = vst [vmem:[%s84_s1] sm:$0xf] %v44_v11 }

// kernel: segrnn_forward.1
= control target key start
LH: loop header
LB: loop body
LE: loop exit
PB: predicated region body
PF: predicated region fallthrough
CT: control target
= control target key end

     0   :  { %vm142_vm0 = vcmask 64512   ;;  %v2346_v0 = vmov 0.0   ;;  %vm2347_vm1 = vmmov 0   ;;  %s2348_s28 = smov 32   ;;  %v2349_v3 = vmov 0   ;;  %s2350_s12 = smov 64   ;;  %s3034_s0 = inlined_call_operand.vmem [shape: f32[8,32], index: 0, kind: input, shape index: {}]   ;;  %s3035_s1 = inlined_call_operand.vmem [shape: f32[72,8], index: 1, kind: input, shape index: {}]   ;;  %s3036_s5 = inlined_call_operand.vmem [shape: f32[352,1], index: 5, kind: input, shape index: {}]   ;;  %s3037_s3 = inlined_call_operand.vmem [shape: f32[192,64], index: 3, kind: input, shape index: {}]   ;;  %s3038_s2 = inlined_call_operand.vmem [shape: f32[100,32], index: 2, kind: input, shape index: {}]   ;;  %s3039_s4 = inlined_call_operand.vmem [shape: f32[196,64], index: 4, kind: input, shape index: {}]   ;;  %s3040_s6 = inlined_call_operand.vmem [shape: f32[96,128], index: 6, kind: input, shape index: {}]   ;;  %s3041_s7 = inlined_call_operand.vmem [shape: f32[2,128], index: 7, kind: output, shape index: {}]  }
   0x1   :  { %1917 = vmatprep.subr.mxu1 %v2346_v0  ;;  %v141_v1 = vld [vmem:[%s3034_s0] sm:$0xff]  ;;  %1919 = vmatprep.mubr.msk.f32.mxu1 %vm2347_vm1, %v2346_v0  ;;  %v98_v4 = vld [vmem:[%s3036_s5 + $0x8] sm:$0xff]  ;;  %v99_v5 = vld [vmem:[%s3036_s5 + $0x10] sm:$0xff]  ;;  %v222_v49 = vlaneseq  ;;  %vm220_vm2 = vcmask 261120   ;;  %vm524_vm3 = vcmask 523264   ;;  %s2352_s13 = smov 16  }
   0x2   :  { %v26_v2 = vld [vmem:[%s3035_s1] sm:$0xff]  ;;  %1918 = vmatpush3.msra.mxu1 %v141_v1  ;;  %217 = vrot.lane.b32.xlu0 %v141_v1, %s2348_s28  ;;  %v27_v6 = vld [vmem:[%s3035_s1 + $0x8] sm:$0xff]  ;;  %v100_v7 = vld [vmem:[%s3036_s5 + $0x18] sm:$0xff]  ;;  %s2353_s14 = smov 112   ;;  %vm1674_vm4 = vcmask 130048   ;;  %vm1677_vm5 = vcmask 392192  }
   0x3   :  { %1920 = vmatmul.mubr.msk.f32.vlgmr.msra.gmra.mrb[0].mxu1 %vm142_vm0, %v26_v2  ;;  %2225 = vset.pattern.permute.xlu1 %v2349_v3  ;;  %v102_v8 = vld [vmem:[%s3036_s5 + $0x28] sm:$0xff]  ;;  %v97_v9 = vld [vmem:[%s3036_s5] sm:$0xff]  ;;  %v104_v10 = vld [vmem:[%s3036_s5 + $0x38] sm:$0xff]  ;;  %v2543_v50 = vshrl.u32 %v222_v49, 7  ;;  %vm1680_vm6 = vcmask 654336   ;;  %vm1682_vm7 = vcmask 785408  }
   0x4   :  { %2224 = vset.pattern.permute.xlu0 %v2349_v3  ;;  %234 = vperm.xlu1 %2225, %v98_v4   ;;  %v101_v11 = vld [vmem:[%s3036_s5 + $0x20] sm:$0xff]  ;;  %v106_v12 = vld [vmem:[%s3036_s5 + $0x48] sm:$0xff]  ;;  %v103_v13 = vld [vmem:[%s3036_s5 + $0x30] sm:$0xff]  ;;  %vm1684_vm8 = vcmask 916480   ;;  %vm1718_vm9 = vcmask 1040384  }
   0x5   :  { %1924 = vmatprep.mubr.msk.f32.mxu1 %vm142_vm0, %v27_v6  ;;  %v130_v14 = vld [vmem:[%s3036_s5 + $0x108] sm:$0xff]  ;;  %v105_v15 = vld [vmem:[%s3036_s5 + $0x40] sm:$0xff]  ;;  %v108_v16 = vld [vmem:[%s3036_s5 + $0x58] sm:$0xff]  ;;  %v224_v52 = vsub.s32 7, %v2543_v50 }
   0x6   :  { %229 = vperm.xlu0 %2224, %v97_v9   ;;  %v129_v17 = vld [vmem:[%s3036_s5 + $0x100] sm:$0xff]  ;;  %v132_v18 = vld [vmem:[%s3036_s5 + $0x118] sm:$0xff]  ;;  %v107_v19 = vld [vmem:[%s3036_s5 + $0x50] sm:$0xff] }
   0x7   :  { %v110_v20 = vld [vmem:[%s3036_s5 + $0x68] sm:$0xff]  ;;  %v131_v21 = vld [vmem:[%s3036_s5 + $0x110] sm:$0xff]  ;;  %v109_v23 = vld [vmem:[%s3036_s5 + $0x60] sm:$0xff] }
   0x8   :  { %239 = vperm.xlu1 %2225, %v99_v5   ;;  %v134_v22 = vld [vmem:[%s3036_s5 + $0x128] sm:$0xff]  ;;  %v112_v24 = vld [vmem:[%s3036_s5 + $0x78] sm:$0xff]  ;;  %v133_v25 = vld [vmem:[%s3036_s5 + $0x120] sm:$0xff] }
   0x9   :  { %v136_v26 = vld [vmem:[%s3036_s5 + $0x138] sm:$0xff]  ;;  %v111_v27 = vld [vmem:[%s3036_s5 + $0x70] sm:$0xff]  ;;  %v114_v28 = vld [vmem:[%s3036_s5 + $0x88] sm:$0xff] }
   0xa   :  { %249 = vperm.xlu0 %2224, %v101_v11   ;;  %v135_v29 = vld [vmem:[%s3036_s5 + $0x130] sm:$0xff]  ;;  %v138_v30 = vld [vmem:[%s3036_s5 + $0x148] sm:$0xff]  ;;  %v113_v31 = vld [vmem:[%s3036_s5 + $0x80] sm:$0xff] }
   0xb   :  { %v116_v32 = vld [vmem:[%s3036_s5 + $0x98] sm:$0xff]  ;;  %v137_v33 = vld [vmem:[%s3036_s5 + $0x140] sm:$0xff]  ;;  %v115_v35 = vld [vmem:[%s3036_s5 + $0x90] sm:$0xff] }
   0xc   :  { %244 = vperm.xlu1 %2225, %v100_v7   ;;  %v140_v34 = vld [vmem:[%s3036_s5 + $0x158] sm:$0xff]  ;;  %v118_v36 = vld [vmem:[%s3036_s5 + $0xa8] sm:$0xff]  ;;  %v139_v37 = vld [vmem:[%s3036_s5 + $0x150] sm:$0xff] }
   0xd   :  { %v120_v38 = vld [vmem:[%s3036_s5 + $0xb8] sm:$0xff]  ;;  %v117_v39 = vld [vmem:[%s3036_s5 + $0xa0] sm:$0xff]  ;;  %v122_v40 = vld [vmem:[%s3036_s5 + $0xc8] sm:$0xff] }
   0xe   :  { %259 = vperm.xlu0 %2224, %v103_v13   ;;  %v119_v41 = vld [vmem:[%s3036_s5 + $0xb0] sm:$0xff]  ;;  %v124_v42 = vld [vmem:[%s3036_s5 + $0xd8] sm:$0xff]  ;;  %v121_v43 = vld [vmem:[%s3036_s5 + $0xc0] sm:$0xff] }
   0xf   :  { %v126_v44 = vld [vmem:[%s3036_s5 + $0xe8] sm:$0xff]  ;;  %v123_v45 = vld [vmem:[%s3036_s5 + $0xd0] sm:$0xff]  ;;  %v128_v46 = vld [vmem:[%s3036_s5 + $0xf8] sm:$0xff] }
  0x10   :  { %254 = vperm.xlu1 %2225, %v102_v8   ;;  %v125_v47 = vld [vmem:[%s3036_s5 + $0xe0] sm:$0xff]  ;;  %v127_v48 = vld [vmem:[%s3036_s5 + $0xf0] sm:$0xff]  ;;  %v29_v59 = vld [vmem:[%s3035_s1 + $0x18] sm:$0xff] }
  0x11   :  { %v28_v58 = vld [vmem:[%s3035_s1 + $0x10] sm:$0xff]  ;;  %v30_v60 = vld [vmem:[%s3035_s1 + $0x20] sm:$0xff]  ;;  %v31_v61 = vld [vmem:[%s3035_s1 + $0x28] sm:$0xff] }
  0x12   :  { %406 = vperm.xlu0 %2224, %v105_v15   ;;  %v32_v62 = vld [vmem:[%s3035_s1 + $0x30] sm:$0xff]  ;;  %v33_v63 = vld [vmem:[%s3035_s1 + $0x38] sm:$0xff]  ;;  %v34_v1 = vld [vmem:[%s3035_s1 + $0x40] sm:$0xff] }
  0x13   :  { %v48_v2 = vld [vmem:[%s3037_s3] sm:$0xff]  ;;  %v59_v49 = vld [vmem:[%s3037_s3 + $0x58] sm:$0xff] }
  0x14   :  { %264 = vperm.xlu1 %2225, %v104_v10   ;;  %1952 = vmatprep.mubr.msk.f32.mxu0 %vm524_vm3, %v48_v2 }
  0x16   :  { %784 = vperm.xlu0 %2224, %v129_v17  }
  0x18   :  { %411 = vperm.xlu1 %2225, %v106_v12  }
  0x1a   :  { %416 = vperm.xlu0 %2224, %v107_v19  }
  0x1c   :  { %789 = vperm.xlu1 %2225, %v130_v14  }
  0x1e   :  { %794 = vperm.xlu0 %2224, %v131_v21  }
  0x20   :  { %421 = vperm.xlu1 %2225, %v108_v16  }
  0x22   :  { %426 = vperm.xlu0 %2224, %v109_v23  }
  0x24   :  { %799 = vperm.xlu1 %2225, %v132_v18  }
  0x26   :  { %832 = vperm.xlu0 %2224, %v133_v25  }
  0x28   :  { %431 = vperm.xlu1 %2225, %v110_v20  }
  0x2a   :  { %436 = vperm.xlu0 %2224, %v111_v27  }
  0x2c   :  { %837 = vperm.xlu1 %2225, %v134_v22  }
  0x2e   :  { %842 = vperm.xlu0 %2224, %v135_v29  }
  0x30   :  { %441 = vperm.xlu1 %2225, %v112_v24  }
  0x32   :  { %446 = vperm.xlu0 %2224, %v113_v31  }
  0x34   :  { %847 = vperm.xlu1 %2225, %v136_v26  }
  0x36   :  { %880 = vperm.xlu0 %2224, %v137_v33  }
  0x38   :  { %451 = vperm.xlu1 %2225, %v114_v28  }
  0x3a   :  { %456 = vperm.xlu0 %2224, %v115_v35  }
  0x3c   :  { %885 = vperm.xlu1 %2225, %v138_v30  }
  0x3e   :  { %890 = vperm.xlu0 %2224, %v139_v37  }
  0x40   :  { %461 = vperm.xlu1 %2225, %v116_v32  }
  0x42   :  { %466 = vperm.xlu0 %2224, %v117_v39   ;;  %v49_v39 = vld [vmem:[%s3037_s3 + $0x8] sm:$0xff] }
  0x44   :  { %895 = vperm.xlu1 %2225, %v140_v34  }
  0x46   :  { %476 = vperm.xlu0 %2224, %v119_v41   ;;  %v51_v41 = vld [vmem:[%s3037_s3 + $0x18] sm:$0xff] }
  0x48   :  { %471 = vperm.xlu1 %2225, %v118_v36  }
  0x4a   :  { %486 = vperm.xlu0 %2224, %v121_v43   ;;  %v53_v43 = vld [vmem:[%s3037_s3 + $0x28] sm:$0xff] }
  0x4c   :  { %481 = vperm.xlu1 %2225, %v120_v38  }
  0x4e   :  { %496 = vperm.xlu0 %2224, %v123_v45   ;;  %v55_v45 = vld [vmem:[%s3037_s3 + $0x38] sm:$0xff] }
  0x50   :  { %491 = vperm.xlu1 %2225, %v122_v40   ;;  %v50_v40 = vld [vmem:[%s3037_s3 + $0x10] sm:$0xff] }
  0x52   :  { %506 = vperm.xlu0 %2224, %v125_v47   ;;  %v57_v47 = vld [vmem:[%s3037_s3 + $0x48] sm:$0xff] }
  0x54   :  { %501 = vperm.xlu1 %2225, %v124_v42   ;;  %v52_v42 = vld [vmem:[%s3037_s3 + $0x20] sm:$0xff] }
  0x56   :  { %516 = vperm.xlu0 %2224, %v127_v48   ;;  %v58_v48 = vld [vmem:[%s3037_s3 + $0x50] sm:$0xff] }
  0x58   :  { %511 = vperm.xlu1 %2225, %v126_v44   ;;  %v54_v44 = vld [vmem:[%s3037_s3 + $0x30] sm:$0xff] }
  0x5c   :  { %521 = vperm.xlu1 %2225, %v128_v46   ;;  %v56_v46 = vld [vmem:[%s3037_s3 + $0x40] sm:$0xff] }
  0x74   :  { %v218_v51 = vpop.permute.xlu0 %217 }
  0x83   :  { %v235_v3 = vpop.permute.xlu1 %234 }
  0x85   :  { %v230_v7 = vpop.permute.xlu0 %229 }
  0x87   :  { %v240_v4 = vpop.permute.xlu1 %239 }
  0x89   :  { %v250_v19 = vpop.permute.xlu0 %249 }
  0x8b   :  { %v245_v5 = vpop.permute.xlu1 %244 }
  0x8d   :  { %v260_v31 = vpop.permute.xlu0 %259 }
  0x8f   :  { %v255_v16 = vpop.permute.xlu1 %254 }
  0x93   :  { %v265_v28 = vpop.permute.xlu1 %264 }
  0x97   :  { %v412_v2 = vpop.permute.xlu1 %411 }
  0xd6   :  { %v212_v53 = vpop.f32.mrb[0].mxu1 }
  0xd7   :  { %v2547_v54 = vsel %vm220_vm2, %v212_v53, %v218_v51  ;;  %v1921_v55 = vpop.f32.mrb[1].mxu1  ;;  %v60_v51 = vld [vmem:[%s3037_s3 + $0x60] sm:$0xff]  ;;  %v62_v53 = vld [vmem:[%s3037_s3 + $0x70] sm:$0xff] }
  0xd8   :  { %v225_v56 = vrot.slane %v2547_v54, %v224_v52  ;;  %v61_v52 = vld [vmem:[%s3037_s3 + $0x68] sm:$0xff]  ;;  %v63_v55 = vld [vmem:[%s3037_s3 + $0x78] sm:$0xff] }
  0xda   :  { %v226_v57 = vsub.f32 %v2547_v54, %v225_v56  ;;  %v64_v56 = vld [vmem:[%s3037_s3 + $0x80] sm:$0xff] }
  0xdc   :  { %1922 = vmatprep.subr.mxu1 %v226_v57 }
  0xdd   :  { %1923 = vmatpush3.msra.mxu1 %v226_v57  ;;  %v65_v57 = vld [vmem:[%s3037_s3 + $0x88] sm:$0xff] }
  0xde   :  { %1925 = vmatmul.mubr.msk.f32.vlgmr.msra.gmra.mrb[2].mxu1 %vm142_vm0, %v28_v58  ;;  %v66_v58 = vld [vmem:[%s3037_s3 + $0x90] sm:$0xff] }
  0xdf   :  { %1927 = vmatprep.mubr.msk.f32.mxu1 %vm142_vm0, %v29_v59  ;;  %v67_v59 = vld [vmem:[%s3037_s3 + $0x98] sm:$0xff] }
  0xe2   :  { %1928 = vmatmul.mubr.msk.f32.gmra.mrb[4].mxu1 %vm142_vm0, %v30_v60  ;;  %v68_v60 = vld [vmem:[%s3037_s3 + $0xa0] sm:$0xff] }
  0xe3   :  { %1930 = vmatprep.mubr.msk.f32.mxu1 %vm142_vm0, %v31_v61  ;;  %v69_v61 = vld [vmem:[%s3037_s3 + $0xa8] sm:$0xff] }
  0xe6   :  { %1931 = vmatmul.mubr.msk.f32.gmra.mrb[6].mxu1 %vm142_vm0, %v32_v62  ;;  %v70_v62 = vld [vmem:[%s3037_s3 + $0xb0] sm:$0xff] }
  0xe7   :  { %1933 = vmatprep.mubr.msk.f32.mxu1 %vm142_vm0, %v33_v63  ;;  %v71_v63 = vld [vmem:[%s3037_s3 + $0xb8] sm:$0xff] }
  0xea   :  { %1934 = vmatmul.mubr.msk.f32.gmra.mrb[8].mxu1 %vm142_vm0, %v34_v1  ;;  %v35_v1 = vld [vmem:[%s3038_s2] sm:$0xff] }
  0xeb   :  { %2022 = vmatprep.mubr.msk.f32.mxu1 %vm220_vm2, %v35_v1 }
 0x1b1   :  { %v1926_v6 = vpop.f32.mrb[2].mxu1 }
 0x1b2   :  { %v363_v8 = vadd.f32 %v1926_v6, %v235_v3  ;;  %v357_v9 = vpop.f32.mrb[3].mxu1  ;;  %v407_v3 = vpop.permute.xlu0 %406 }
 0x1b3   :  { %v358_v10 = vadd.f32 %v357_v9, %v230_v7 }
 0x1b4   :  { %v397_v11 = vmax.f32 %v363_v8, 0.0 }
 0x1b5   :  { %v396_v12 = vmax.f32 %v358_v10, 0.0  ;;  %v1929_v13 = vpop.f32.mrb[4].mxu1 }
 0x1b6   :  { %v373_v14 = vadd.f32 %v1929_v13, %v245_v5  ;;  %v367_v15 = vpop.f32.mrb[5].mxu1  ;;  %v2682_v5 = vpop.permute.xlu0 %784 }
 0x1b7   :  { %v368_v17 = vadd.f32 %v367_v15, %v240_v4  ;;  %v2108_v18 = vpack.c.bf16 %v397_v11, %v396_v12  ;;  %v2680_v4 = vpop.permute.xlu1 %789 }
 0x1b8   :  { %v399_v20 = vmax.f32 %v373_v14, 0.0 }
 0x1b9   :  { %v398_v21 = vmax.f32 %v368_v17, 0.0  ;;  %v1932_v22 = vpop.f32.mrb[6].mxu1  ;;  %2109 = vmatprep.subr.bf16.mxu0 %v2108_v18 }
 0x1ba   :  { %v383_v23 = vadd.f32 %v1932_v22, %v255_v16  ;;  %v377_v24 = vpop.f32.mrb[7].mxu1  ;;  %2111 = vmatpush3.bf16.msra.mxu0 %v2108_v18  ;;  %v417_v7 = vpop.permute.xlu0 %416 }
 0x1bb   :  { %v2112_v25 = vpack.c.bf16 %v399_v20, %v398_v21  ;;  %v378_v26 = vadd.f32 %v377_v24, %v250_v19  ;;  %v422_v6 = vpop.permute.xlu1 %421 }
 0x1bc   :  { %v401_v27 = vmax.f32 %v383_v23, 0.0 }
 0x1bd   :  { %v400_v29 = vmax.f32 %v378_v26, 0.0  ;;  %v1935_v30 = vpop.f32.mrb[8].mxu1  ;;  %2113 = vmatprep.subr.bf16.mxu0 %v2112_v25 }
 0x1be   :  { %v393_v32 = vadd.f32 %v1935_v30, %v265_v28  ;;  %v387_v33 = vpop.f32.mrb[9].mxu1  ;;  %2115 = vmatpush3.bf16.msra.mxu0 %v2112_v25  ;;  %v2686_v9 = vpop.permute.xlu0 %794 }
 0x1bf   :  { %v2116_v34 = vpack.c.bf16 %v401_v27, %v400_v29  ;;  %v388_v35 = vadd.f32 %v387_v33, %v260_v31  ;;  %v2684_v8 = vpop.permute.xlu1 %799 }
 0x1c0   :  { %v403_v36 = vmax.f32 %v393_v32, 0.0 }
 0x1c1   :  { %v402_v37 = vmax.f32 %v388_v35, 0.0  ;;  %2117 = vmatprep.subr.bf16.mxu0 %v2116_v34 }
 0x1c2   :  { %2119 = vmatpush3.bf16.msra.mxu0 %v2116_v34  ;;  %v427_v11 = vpop.permute.xlu0 %426 }
 0x1c3   :  { %v2120_v38 = vpack.c.bf16 %v403_v36, %v402_v37  ;;  %v432_v10 = vpop.permute.xlu1 %431 }
 0x1c5   :  { %2121 = vmatprep.subr.bf16.mxu0 %v2120_v38 }
 0x1c6   :  { %2123 = vmatpush3.bf16.msra.mxu0 %v2120_v38  ;;  %v2690_v13 = vpop.permute.xlu0 %832 }
 0x1c7   :  { %v2688_v12 = vpop.permute.xlu1 %837 }
 0x1c9   :  { %1953 = vmatmul.mubr.msk.f32.vlgmr.msra.gmra.mrb[0].mxu0 %vm524_vm3, %v49_v39 }
 0x1ca   :  { %1955 = vmatprep.mubr.msk.f32.mxu0 %vm524_vm3, %v50_v40  ;;  %v437_v22 = vpop.permute.xlu0 %436 }
 0x1cb   :  { %v442_v19 = vpop.permute.xlu1 %441 }
 0x1cd   :  { %1956 = vmatmul.mubr.msk.f32.gmra.mrb[2].mxu0 %vm524_vm3, %v51_v41 }
 0x1ce   :  { %1958 = vmatprep.mubr.msk.f32.mxu0 %vm524_vm3, %v52_v42  ;;  %v2698_v37 = vpop.permute.xlu0 %842 }
 0x1cf   :  { %v2696_v34 = vpop.permute.xlu1 %847 }
 0x1d1   :  { %1959 = vmatmul.mubr.msk.f32.gmra.mrb[4].mxu0 %vm524_vm3, %v53_v43 }
 0x1d2   :  { %1961 = vmatprep.mubr.msk.f32.mxu0 %vm524_vm3, %v54_v44 }
 0x1d5   :  { %1962 = vmatmul.mubr.msk.f32.gmra.mrb[6].mxu0 %vm524_vm3, %v55_v45 }
 0x1d6   :  { %1964 = vmatprep.mubr.msk.f32.mxu0 %vm524_vm3, %v56_v46 }
 0x1d9   :  { %1965 = vmatmul.mubr.msk.f32.gmra.mrb[8].mxu0 %vm524_vm3, %v57_v47  ;;  %v452_v47 = vpop.permute.xlu1 %451 }
 0x1da   :  { %1967 = vmatprep.mubr.msk.f32.mxu0 %vm524_vm3, %v58_v48 }
 0x1dd   :  { %1968 = vmatmul.mubr.msk.f32.gmra.mrb[10].mxu0 %vm524_vm3, %v59_v49 }
 0x1de   :  { %1970 = vmatprep.mubr.msk.f32.mxu0 %vm524_vm3, %v60_v51 }
 0x1e1   :  { %1971 = vmatmul.mubr.msk.f32.gmra.mrb[12].mxu0 %vm524_vm3, %v61_v52  ;;  %v447_v52 = vpop.permute.xlu0 %446 }
 0x1e2   :  { %1973 = vmatprep.mubr.msk.f32.mxu0 %vm524_vm3, %v62_v53 }
 0x1e5   :  { %1974 = vmatmul.mubr.msk.f32.gmra.mrb[14].mxu0 %vm524_vm3, %v63_v55 }
 0x1e6   :  { %1976 = vmatprep.mubr.msk.f32.mxu0 %vm524_vm3, %v64_v56 }
 0x1e9   :  { %1977 = vmatmul.mubr.msk.f32.gmra.mrb[16].mxu0 %vm524_vm3, %v65_v57 }
 0x1ea   :  { %1979 = vmatprep.mubr.msk.f32.mxu0 %vm524_vm3, %v66_v58 }
 0x1ed   :  { %1980 = vmatmul.mubr.msk.f32.gmra.mrb[18].mxu0 %vm524_vm3, %v67_v59 }
 0x1ee   :  { %1982 = vmatprep.mubr.msk.f32.mxu0 %vm524_vm3, %v68_v60 }
 0x1f1   :  { %1983 = vmatmul.mubr.msk.f32.gmra.mrb[20].mxu0 %vm524_vm3, %v69_v61 }
 0x1f2   :  { %1985 = vmatprep.mubr.msk.f32.mxu0 %vm524_vm3, %v70_v62 }
 0x1f5   :  { %1986 = vmatmul.mubr.msk.f32.gmra.mrb[22].mxu0 %vm524_vm3, %v71_v63 }
 0x1f6   :  { %1996 = vmatprep.mubr.msk.f32.mxu0 %vm220_vm2, %v35_v1  ;;  %v2704_v1 = vpop.permute.xlu1 %885 }
 0x29c   :  { %v1954_v14 = vpop.f32.mrb[0].mxu0 }
 0x29d   :  { %v669_v15 = vadd.f32 %v1954_v14, %v412_v2  ;;  %v663_v16 = vpop.f32.mrb[1].mxu0 }
 0x29e   :  { %v664_v17 = vadd.f32 %v663_v16, %v407_v3  ;;  %v2706_v3 = vpop.permute.xlu0 %880 }
 0x29f   :  { %v803_v18 = vadd.f32 %v2680_v4, %v669_v15 }
 0x2a0   :  { %v802_v20 = vadd.f32 %v2682_v5, %v664_v17  ;;  %v1957_v21 = vpop.f32.mrb[2].mxu0 }
 0x2a1   :  { %v1759_v23 = vmul.f32 -1.442695, %v803_v18  ;;  %v679_v24 = vadd.f32 %v1957_v21, %v422_v6  ;;  %v673_v25 = vpop.f32.mrb[3].mxu0 }
 0x2a2   :  { %v1758_v26 = vmul.f32 -1.442695, %v802_v20  ;;  %v674_v27 = vadd.f32 %v673_v25, %v417_v7  ;;  %v457_v16 = vpop.permute.xlu0 %456 }
 0x2a3   :  { %2226 = vpow2.f32 %v1759_v23  ;;  %v805_v28 = vadd.f32 %v2684_v8, %v679_v24 }
 0x2a4   :  { %2228 = vpow2.f32 %v1758_v26  ;;  %v804_v29 = vadd.f32 %v2686_v9, %v674_v27  ;;  %v1960_v30 = vpop.f32.mrb[4].mxu0 }
 0x2a5   :  { %v1761_v31 = vmul.f32 -1.442695, %v805_v28  ;;  %v689_v32 = vadd.f32 %v1960_v30, %v432_v10  ;;  %v683_v33 = vpop.f32.mrb[5].mxu0 }
 0x2a6   :  { %v1760_v35 = vmul.f32 -1.442695, %v804_v29  ;;  %v684_v36 = vadd.f32 %v683_v33, %v427_v11  ;;  %v462_v11 = vpop.permute.xlu1 %461 }
 0x2a7   :  { %2230 = vpow2.f32 %v1761_v31  ;;  %v851_v38 = vadd.f32 %v2688_v12, %v689_v32  ;;  %v2712_v32 = vpop.permute.xlu0 %890 }
 0x2a8   :  { %2232 = vpow2.f32 %v1760_v35  ;;  %v850_v39 = vadd.f32 %v2690_v13, %v684_v36  ;;  %v1963_v40 = vpop.f32.mrb[6].mxu0 }
 0x2a9   :  { %v1763_v41 = vmul.f32 -1.442695, %v851_v38  ;;  %v699_v42 = vadd.f32 %v1963_v40, %v442_v19  ;;  %v693_v43 = vpop.f32.mrb[7].mxu0 }
 0x2aa   :  { %v1762_v44 = vmul.f32 -1.442695, %v850_v39  ;;  %v694_v45 = vadd.f32 %v693_v43, %v437_v22  ;;  %v2710_v29 = vpop.permute.xlu1 %895 }
 0x2ab   :  { %2234 = vpow2.f32 %v1763_v41  ;;  %v853_v46 = vadd.f32 %v2696_v34, %v699_v42 }
 0x2ac   :  { %2236 = vpow2.f32 %v1762_v44  ;;  %v852_v48 = vadd.f32 %v2698_v37, %v694_v45  ;;  %v1966_v49 = vpop.f32.mrb[8].mxu0 }
 0x2ad   :  { %v2227_v51 = vpop.eup %2226  ;;  %v1765_v53 = vmul.f32 -1.442695, %v853_v46  ;;  %v703_v55 = vpop.f32.mrb[9].mxu0  ;;  %v709_v21 = vadd.f32 %v1966_v49, %v452_v47 }
 0x2ae   :  { %v2229_v56 = vpop.eup %2228  ;;  %v819_v57 = vadd.f32 1.0, %v2227_v51  ;;  %v1764_v58 = vmul.f32 -1.442695, %v852_v48  ;;  %v704_v24 = vadd.f32 %v703_v55, %v447_v52 }
 0x2af   :  { %v818_v59 = vadd.f32 1.0, %v2229_v56  ;;  %2238 = vpow2.f32 %v1765_v53 }
 0x2b0   :  { %2240 = vrcp.f32 %v819_v57  ;;  %v1969_v60 = vpop.f32.mrb[10].mxu0 }
 0x2b1   :  { %v2231_v61 = vpop.eup %2230  ;;  %2242 = vrcp.f32 %v818_v59  ;;  %v713_v62 = vpop.f32.mrb[11].mxu0  ;;  %v719_v33 = vadd.f32 %v1969_v60, %v462_v11 }
 0x2b2   :  { %v2233_v63 = vpop.eup %2232  ;;  %v821_v2 = vadd.f32 1.0, %v2231_v61  ;;  %2244 = vpow2.f32 %v1764_v58  ;;  %v714_v36 = vadd.f32 %v713_v62, %v457_v16 }
 0x2b3   :  { %v820_v6 = vadd.f32 1.0, %v2233_v63 }
 0x2b4   :  { %2246 = vrcp.f32 %v821_v2 }
 0x2b5   :  { %v2235_v7 = vpop.eup %2234  ;;  %2248 = vrcp.f32 %v820_v6 }
 0x2b6   :  { %v2237_v10 = vpop.eup %2236  ;;  %v867_v14 = vadd.f32 1.0, %v2235_v7 }
 0x2b7   :  { %v866_v17 = vadd.f32 1.0, %v2237_v10 }
 0x2b8   :  { %2250 = vrcp.f32 %v867_v14 }
 0x2b9   :  { %v2239_v15 = vpop.eup %2238  ;;  %2252 = vrcp.f32 %v866_v17 }
 0x2ba   :  { %v2241_v18 = vpop.eup %2240  ;;  %v869_v19 = vadd.f32 1.0, %v2239_v15 }
 0x2bb   :  { %v2243_v20 = vpop.eup %2242  ;;  %v899_v22 = vmul.f32 %v2241_v18, %v2704_v1  ;;  %v2739_v18 = vld [vmem:[%s3038_s2 + $0x8] sm:$0xff] }
 0x2bc   :  { %v2245_v23 = vpop.eup %2244  ;;  %v898_v25 = vmul.f32 %v2243_v20, %v2706_v3  ;;  %2254 = vrcp.f32 %v869_v19  ;;  %v2744_v19 = vld [vmem:[%s3038_s2 + $0x10] sm:$0xff]  ;;  %v2753_v20 = vld [vmem:[%s3038_s2 + $0x18] sm:$0xff] }
 0x2bd   :  { %v868_v26 = vadd.f32 1.0, %v2245_v23  ;;  %v903_v27 = vadd.f32 %v899_v22, %v709_v21  ;;  %v2758_v21 = vld [vmem:[%s3038_s2 + $0x20] sm:$0xff]  ;;  %v2767_v22 = vld [vmem:[%s3038_s2 + $0x28] sm:$0xff]  ;;  %v2772_v23 = vld [vmem:[%s3038_s2 + $0x30] sm:$0xff] }
 0x2be   :  { %v2247_v28 = vpop.eup %2246  ;;  %v902_v30 = vadd.f32 %v898_v25, %v704_v24  ;;  %v2781_v24 = vld [vmem:[%s3038_s2 + $0x38] sm:$0xff]  ;;  %v2786_v25 = vld [vmem:[%s3038_s2 + $0x40] sm:$0xff] }
 0x2bf   :  { %v2249_v31 = vpop.eup %2248  ;;  %2256 = vrcp.f32 %v868_v26  ;;  %v901_v35 = vmul.f32 %v2247_v28, %v2710_v29  ;;  %v2795_v26 = vld [vmem:[%s3038_s2 + $0x48] sm:$0xff]  ;;  %v2809_v28 = vld [vmem:[%s3038_s2 + $0x58] sm:$0xff] }
 0x2c0   :  { %2258 = vtanh.f32 %v903_v27  ;;  %v900_v38 = vmul.f32 %v2249_v31, %v2712_v32  ;;  %v2800_v27 = vld [vmem:[%s3038_s2 + $0x50] sm:$0xff]  ;;  %v467_v31 = vpop.permute.xlu0 %466 }
 0x2c1   :  { %2260 = vtanh.f32 %v902_v30  ;;  %v905_v39 = vadd.f32 %v901_v35, %v719_v33  ;;  %v472_v30 = vpop.permute.xlu1 %471 }
 0x2c2   :  { %v904_v40 = vadd.f32 %v900_v38, %v714_v36  ;;  %v2251_v43 = vpop.eup %2250  ;;  %v2190_v35 = vadd.f32 %v2680_v4, %v472_v30  ;;  %v2192_v38 = vadd.f32 %v2682_v5, %v467_v31 }
 0x2c3   :  { %2262 = vtanh.f32 %v905_v39  ;;  %v2253_v44 = vpop.eup %2252  ;;  %v911_v49 = vsub.f32 1.0, %v2251_v43  ;;  %v919_v56 = vmul.f32 0.0, %v2251_v43 }
 0x2c4   :  { %2264 = vtanh.f32 %v904_v40  ;;  %v2716_v41 = vpop.f32.mrb[20].mxu0  ;;  %v910_v52 = vsub.f32 1.0, %v2253_v44  ;;  %v918_v58 = vmul.f32 0.0, %v2253_v44  ;;  %v477_v36 = vpop.permute.xlu0 %476 }
 0x2c5   :  { %v2718_v42 = vpop.f32.mrb[21].mxu0  ;;  %v482_v33 = vpop.permute.xlu1 %481 }
 0x2c6   :  { %v2255_v45 = vpop.eup %2254 }
 0x2c7   :  { %v913_v59 = vsub.f32 1.0, %v2255_v45  ;;  %v921_v7 = vmul.f32 0.0, %v2255_v45  ;;  %v2194_v45 = vadd.f32 %v2684_v8, %v482_v33 }
 0x2c8   :  { %v2720_v46 = vpop.f32.mrb[22].mxu0 }
 0x2c9   :  { %v2257_v47 = vpop.eup %2256  ;;  %v2722_v48 = vpop.f32.mrb[23].mxu0 }
 0x2ca   :  { %v2259_v51 = vpop.eup %2258  ;;  %v912_v62 = vsub.f32 1.0, %v2257_v47  ;;  %v920_v11 = vmul.f32 0.0, %v2257_v47 }
 0x2cb   :  { %v2261_v53 = vpop.eup %2260  ;;  %v915_v55 = vmul.f32 %v2259_v51, %v911_v49  ;;  %v492_v49 = vpop.permute.xlu1 %491  ;;  %v2196_v51 = vadd.f32 %v2686_v9, %v477_v36 }
 0x2cc   :  { %v914_v57 = vmul.f32 %v2261_v53, %v910_v52 }
 0x2cd   :  { %v2263_v60 = vpop.eup %2262  ;;  %v2724_v61 = vadd.f32 %v919_v56, %v915_v55  ;;  %v487_v55 = vpop.permute.xlu0 %486 }
 0x2ce   :  { %v2265_v63 = vpop.eup %2264  ;;  %v2726_v2 = vadd.f32 %v918_v58, %v914_v57  ;;  %v917_v6 = vmul.f32 %v2263_v60, %v913_v59  ;;  %v2198_v59 = vadd.f32 %v2688_v12, %v492_v49 }
 0x2cf   :  { %v916_v10 = vmul.f32 %v2265_v63, %v912_v62  ;;  %v2200_v62 = vadd.f32 %v2690_v13, %v487_v55 }
 0x2d0   :  { %v2124_v14 = vpack.c.bf16 %v2724_v61, %v2726_v2  ;;  %v2730_v15 = vadd.f32 %v921_v7, %v917_v6 }
 0x2d1   :  { %v2732_v16 = vadd.f32 %v920_v11, %v916_v10  ;;  %v502_v11 = vpop.permute.xlu1 %501  ;;  %v497_v30 = vpop.permute.xlu0 %496 }
 0x2d2   :  { %2125 = vmatprep.subr.bf16.mxu0 %v2124_v14  ;;  %v2204_v33 = vadd.f32 %v2698_v37, %v497_v30 }
 0x2d3   :  { %2127 = vmatpush3.bf16.msra.mxu0 %v2124_v14  ;;  %v2128_v17 = vpack.c.bf16 %v2730_v15, %v2732_v16 }
 0x2d5   :  { %2129 = vmatprep.subr.bf16.mxu0 %v2128_v17 }
 0x2d7   :  { %2131 = vmatpush3.bf16.msra.mxu0 %v2128_v17  ;;  %v2202_v17 = vadd.f32 %v2696_v34, %v502_v11  ;;  %v507_v11 = vpop.permute.xlu0 %506 }
 0x2da   :  { %1997 = vmatmul.mubr.msk.f32.vlgmr.msra.gmra.mrb[12].mxu0 %vm220_vm2, %v2739_v18 }
 0x2db   :  { %1999 = vmatprep.mubr.msk.f32.mxu0 %vm220_vm2, %v2744_v19 }
 0x2de   :  { %2000 = vmatmul.mubr.msk.f32.gmra.mrb[14].mxu0 %vm220_vm2, %v2753_v20 }
 0x2df   :  { %2002 = vmatprep.mubr.msk.f32.mxu0 %vm220_vm2, %v2758_v21 }
 0x2e2   :  { %2003 = vmatmul.mubr.msk.f32.gmra.mrb[16].mxu0 %vm220_vm2, %v2767_v22 }
 0x2e3   :  { %2005 = vmatprep.mubr.msk.f32.mxu0 %vm220_vm2, %v2772_v23 }
 0x2e6   :  { %2006 = vmatmul.mubr.msk.f32.gmra.mrb[18].mxu0 %vm220_vm2, %v2781_v24 }
 0x2e7   :  { %2008 = vmatprep.mubr.msk.f32.mxu0 %vm220_vm2, %v2786_v25 }
 0x2ea   :  { %2009 = vmatmul.mubr.msk.f32.gmra.mrb[24].mxu0 %vm220_vm2, %v2795_v26 }
 0x2eb   :  { %2011 = vmatprep.mubr.msk.f32.mxu0 %vm220_vm2, %v2800_v27 }
 0x2ee   :  { %2012 = vmatmul.mubr.msk.f32.gmra.mrb[26].mxu0 %vm220_vm2, %v2809_v28 }
 0x3ad   :  { %v1998_v39 = vpop.f32.mrb[12].mxu0 }
 0x3ae   :  { %v2191_v40 = vadd.f32 %v2190_v35, %v1998_v39  ;;  %v1028_v43 = vpop.f32.mrb[13].mxu0 }
 0x3af   :  { %v2193_v44 = vadd.f32 %v2192_v38, %v1028_v43 }
 0x3b0   :  { %v1779_v47 = vmul.f32 -1.442695, %v2191_v40 }
 0x3b1   :  { %v1778_v52 = vmul.f32 -1.442695, %v2193_v44  ;;  %v2001_v53 = vpop.f32.mrb[14].mxu0 }
 0x3b2   :  { %2266 = vpow2.f32 %v1779_v47  ;;  %v2195_v56 = vadd.f32 %v2194_v45, %v2001_v53  ;;  %v1038_v57 = vpop.f32.mrb[15].mxu0 }
 0x3b3   :  { %2268 = vpow2.f32 %v1778_v52  ;;  %v2197_v58 = vadd.f32 %v2196_v51, %v1038_v57 }
 0x3b4   :  { %v1781_v60 = vmul.f32 -1.442695, %v2195_v56 }
 0x3b5   :  { %v1780_v63 = vmul.f32 -1.442695, %v2197_v58  ;;  %v2004_v6 = vpop.f32.mrb[16].mxu0 }
 0x3b6   :  { %2270 = vpow2.f32 %v1781_v60  ;;  %v2199_v7 = vadd.f32 %v2198_v59, %v2004_v6  ;;  %v1048_v10 = vpop.f32.mrb[17].mxu0  ;;  %v512_v6 = vpop.permute.xlu1 %511 }
 0x3b7   :  { %2272 = vpow2.f32 %v1780_v63  ;;  %v2201_v14 = vadd.f32 %v2200_v62, %v1048_v10 }
 0x3b8   :  { %v1783_v31 = vmul.f32 -1.442695, %v2199_v7 }
 0x3b9   :  { %v1782_v35 = vmul.f32 -1.442695, %v2201_v14  ;;  %v2007_v36 = vpop.f32.mrb[18].mxu0 }
 0x3ba   :  { %2274 = vpow2.f32 %v1783_v31  ;;  %v2203_v38 = vadd.f32 %v2202_v17, %v2007_v36  ;;  %v1058_v39 = vpop.f32.mrb[19].mxu0  ;;  %v769_v36 = vadd.f32 %v2716_v41, %v512_v6 }
 0x3bb   :  { %2276 = vpow2.f32 %v1782_v35  ;;  %v2205_v40 = vadd.f32 %v2204_v33, %v1058_v39 }
 0x3bc   :  { %v2267_v43 = vpop.eup %2266  ;;  %v1785_v44 = vmul.f32 -1.442695, %v2203_v38 }
 0x3bd   :  { %v2269_v45 = vpop.eup %2268  ;;  %v1104_v47 = vadd.f32 1.0, %v2267_v43  ;;  %v1784_v49 = vmul.f32 -1.442695, %v2205_v40  ;;  %v2010_v51 = vpop.f32.mrb[24].mxu0  ;;  %v764_v40 = vadd.f32 %v2718_v42, %v507_v11 }
 0x3be   :  { %v1103_v52 = vadd.f32 1.0, %v2269_v45  ;;  %2278 = vpow2.f32 %v1785_v44  ;;  %v1068_v53 = vpop.f32.mrb[25].mxu0  ;;  %v1074_v17 = vadd.f32 %v2010_v51, %v2704_v1  ;;  %v522_v51 = vpop.permute.xlu1 %521 }
 0x3bf   :  { %2280 = vrcp.f32 %v1104_v47  ;;  %v1069_v33 = vadd.f32 %v1068_v53, %v2706_v3  ;;  %v779_v41 = vadd.f32 %v2720_v46, %v522_v51 }
 0x3c0   :  { %v2271_v55 = vpop.eup %2270  ;;  %2282 = vrcp.f32 %v1103_v52 }
 0x3c1   :  { %v2273_v56 = vpop.eup %2272  ;;  %v1106_v57 = vadd.f32 1.0, %v2271_v55  ;;  %2284 = vpow2.f32 %v1784_v49  ;;  %v2013_v58 = vpop.f32.mrb[26].mxu0 }
 0x3c2   :  { %v1105_v59 = vadd.f32 1.0, %v2273_v56  ;;  %v1078_v60 = vpop.f32.mrb[27].mxu0  ;;  %v1084_v47 = vadd.f32 %v2013_v58, %v2710_v29  ;;  %v517_v56 = vpop.permute.xlu0 %516 }
 0x3c3   :  { %2286 = vrcp.f32 %v1106_v57  ;;  %v1079_v53 = vadd.f32 %v1078_v60, %v2712_v32  ;;  %v774_v42 = vadd.f32 %v2722_v48, %v517_v56 }
 0x3c4   :  { %v2275_v62 = vpop.eup %2274  ;;  %2288 = vrcp.f32 %v1105_v59 }
 0x3c5   :  { %v2277_v63 = vpop.eup %2276  ;;  %v1132_v7 = vadd.f32 1.0, %v2275_v62 }
 0x3c6   :  { %v1131_v14 = vadd.f32 1.0, %v2277_v63 }
 0x3c7   :  { %2290 = vrcp.f32 %v1132_v7 }
 0x3c8   :  { %v2279_v10 = vpop.eup %2278  ;;  %2292 = vrcp.f32 %v1131_v14 }
 0x3c9   :  { %v2281_v30 = vpop.eup %2280  ;;  %v1134_v31 = vadd.f32 1.0, %v2279_v10 }
 0x3ca   :  { %v2283_v35 = vpop.eup %2282  ;;  %v1144_v38 = vmul.f32 %v2281_v30, %v1074_v17 }
 0x3cb   :  { %v2285_v39 = vpop.eup %2284  ;;  %v1143_v43 = vmul.f32 %v2283_v35, %v1069_v33  ;;  %2294 = vrcp.f32 %v1134_v31 }
 0x3cc   :  { %v1133_v44 = vadd.f32 1.0, %v2285_v39  ;;  %v1148_v45 = vadd.f32 %v1144_v38, %v769_v36 }
 0x3cd   :  { %v2287_v49 = vpop.eup %2286  ;;  %v1147_v52 = vadd.f32 %v1143_v43, %v764_v40 }
 0x3ce   :  { %v2289_v55 = vpop.eup %2288  ;;  %2296 = vrcp.f32 %v1133_v44  ;;  %v1146_v57 = vmul.f32 %v2287_v49, %v1084_v47 }
 0x3cf   :  { %2298 = vtanh.f32 %v1148_v45  ;;  %v1145_v59 = vmul.f32 %v2289_v55, %v1079_v53 }
 0x3d0   :  { %2300 = vtanh.f32 %v1147_v52  ;;  %v1150_v62 = vadd.f32 %v1146_v57, %v779_v41 }
 0x3d1   :  { %v1149_v63 = vadd.f32 %v1145_v59, %v774_v42  ;;  %v2291_v58 = vpop.eup %2290  ;;  %v80_v59 = vld [vmem:[%s3039_s4 + $0x40] sm:$0xff] }
 0x3d2   :  { %2302 = vtanh.f32 %v1150_v62  ;;  %v2293_v6 = vpop.eup %2292  ;;  %v1156_v60 = vsub.f32 1.0, %v2291_v58  ;;  %v1164_v30 = vmul.f32 %v2291_v58, %v2724_v61  ;;  %v81_v62 = vld [vmem:[%s3039_s4 + $0x48] sm:$0xff]  ;;  %v82_v58 = vld [vmem:[%s3039_s4 + $0x50] sm:$0xff] }
 0x3d3   :  { %2304 = vtanh.f32 %v1149_v63  ;;  %v1155_v14 = vsub.f32 1.0, %v2293_v6  ;;  %v1163_v48 = vmul.f32 %v2293_v6, %v2726_v2  ;;  %v2156_v63 = vpack.c.bf16 %v81_v62, %v80_v59  ;;  %v83_v6 = vld [vmem:[%s3039_s4 + $0x58] sm:$0xff] }
 0x3d5   :  { %v2295_v7 = vpop.eup %2294 }
 0x3d6   :  { %v1158_v33 = vsub.f32 1.0, %v2295_v7  ;;  %v1166_v44 = vmul.f32 %v2295_v7, %v2730_v15  ;;  %v2160_v7 = vpack.c.bf16 %v83_v6, %v82_v58 }
 0x3d8   :  { %v2297_v10 = vpop.eup %2296 }
 0x3d9   :  { %v2299_v11 = vpop.eup %2298  ;;  %v1157_v38 = vsub.f32 1.0, %v2297_v10  ;;  %v1165_v47 = vmul.f32 %v2297_v10, %v2732_v16  ;;  %v84_v10 = vld [vmem:[%s3039_s4 + $0x60] sm:$0xff] }
 0x3da   :  { %v2301_v17 = vpop.eup %2300  ;;  %v1160_v46 = vmul.f32 %v2299_v11, %v1156_v60  ;;  %v85_v60 = vld [vmem:[%s3039_s4 + $0x68] sm:$0xff]  ;;  %v86_v11 = vld [vmem:[%s3039_s4 + $0x70] sm:$0xff] }
 0x3db   :  { %v1159_v31 = vmul.f32 %v2301_v17, %v1155_v14  ;;  %v2164_v14 = vpack.c.bf16 %v85_v60, %v84_v10  ;;  %v87_v17 = vld [vmem:[%s3039_s4 + $0x78] sm:$0xff] }
 0x3dc   :  { %v2303_v35 = vpop.eup %2302  ;;  %v1168_v36 = vadd.f32 %v1164_v30, %v1160_v46  ;;  %v2168_v46 = vpack.c.bf16 %v87_v17, %v86_v11  ;;  %v2351_v30 = vmov 0.0|0.0  }
 0x3dd   :  { %v2305_v39 = vpop.eup %2304  ;;  %v1167_v40 = vadd.f32 %v1163_v48, %v1159_v31  ;;  %v1162_v43 = vmul.f32 %v2303_v35, %v1158_v33  ;;  %v1317_v48 = vld [vmem:[%s3040_s6 + $0x8] sm:$0xff] }
 0x3de   :  { %1177 = vrot.lane.b32.xlu1 %v1168_v36, %s2350_s12  ;;  %v1161_v45 = vmul.f32 %v2305_v39, %v1157_v38 }
 0x3df   :  { %1175 = vrot.lane.b32.xlu0 %v1167_v40, %s2350_s12  ;;  %v1170_v61 = vadd.f32 %v1166_v44, %v1162_v43  ;;  %v1319_v44 = vld [vmem:[%s3040_s6 + $0x18] sm:$0xff] }
 0x3e0   :  { %v1169_v49 = vadd.f32 %v1165_v47, %v1161_v45 }
 0x3e2   :  { %1181 = vrot.lane.b32.xlu1 %v1170_v61, %s2350_s12 }
 0x3e3   :  { %1179 = vrot.lane.b32.xlu0 %v1169_v49, %s2350_s12 }
 0x450   :  { %v1178_v2 = vpop.permute.xlu1 %1177 }
 0x451   :  { %v2838_v51 = vsel %vm524_vm3, %v1168_v36, %v1178_v2  ;;  %v1176_v52 = vpop.permute.xlu0 %1175  ;;  %v1316_v36 = vld [vmem:[%s3040_s6] sm:$0xff] }
 0x452   :  { %v2841_v15 = vsel %vm524_vm3, %v1167_v40, %v1176_v52 }
 0x453   :  { %v2132_v53 = vpack.c.bf16 %v2838_v51, %v2841_v15 }
 0x454   :  { %v1182_v16 = vpop.permute.xlu1 %1181 }
 0x455   :  { %v2846_v55 = vsel %vm524_vm3, %v1170_v61, %v1182_v16  ;;  %2133 = vmatprep.subr.bf16.mxu1 %v2132_v53  ;;  %v1180_v56 = vpop.permute.xlu0 %1179  ;;  %v1321_v16 = vld [vmem:[%s3040_s6 + $0x28] sm:$0xff] }
 0x456   :  { %v2849_v41 = vsel %vm524_vm3, %v1169_v49, %v1180_v56  ;;  %2135 = vmatpush3.bf16.msra.mxu1 %v2132_v53 }
 0x457   :  { %v2136_v57 = vpack.c.bf16 %v2846_v55, %v2849_v41 }
 0x459   :  { %2137 = vmatprep.subr.bf16.mxu1 %v2136_v57 }
 0x45a   :  { %2139 = vmatpush3.bf16.msra.mxu1 %v2136_v57 }
 0x45d   :  { %2023 = vmatmul.mubr.msk.f32.vlgmr.msra.gmra.mrb[10].mxu1 %vm220_vm2, %v2739_v18  ;;  %v72_v18 = vld [vmem:[%s3039_s4] sm:$0xff] }
 0x45e   :  { %2025 = vmatprep.mubr.msk.f32.mxu1 %vm220_vm2, %v2744_v19  ;;  %v73_v19 = vld [vmem:[%s3039_s4 + $0x8] sm:$0xff] }
 0x461   :  { %2026 = vmatmul.mubr.msk.f32.gmra.mrb[12].mxu1 %vm220_vm2, %v2753_v20  ;;  %v2140_v20 = vpack.c.bf16 %v73_v19, %v72_v18  ;;  %v1320_v18 = vld [vmem:[%s3040_s6 + $0x20] sm:$0xff] }
 0x462   :  { %2028 = vmatprep.mubr.msk.f32.mxu1 %vm220_vm2, %v2758_v21  ;;  %v74_v21 = vld [vmem:[%s3039_s4 + $0x10] sm:$0xff] }
 0x463   :  { %2141 = vmatprep.subr.bf16.mxu1 %v2140_v20 }
 0x464   :  { %2143 = vmatpush3.bf16.msra.mxu1 %v2140_v20 }
 0x465   :  { %2029 = vmatmul.mubr.msk.f32.gmra.mrb[14].mxu1 %vm220_vm2, %v2767_v22  ;;  %v75_v22 = vld [vmem:[%s3039_s4 + $0x18] sm:$0xff] }
 0x466   :  { %2031 = vmatprep.mubr.msk.f32.mxu1 %vm220_vm2, %v2772_v23  ;;  %v2144_v23 = vpack.c.bf16 %v75_v22, %v74_v21 }
 0x468   :  { %2145 = vmatprep.subr.bf16.mxu1 %v2144_v23 }
 0x469   :  { %2032 = vmatmul.mubr.msk.f32.gmra.mrb[16].mxu1 %vm220_vm2, %v2781_v24  ;;  %v76_v24 = vld [vmem:[%s3039_s4 + $0x20] sm:$0xff] }
 0x46a   :  { %2034 = vmatprep.mubr.msk.f32.mxu1 %vm220_vm2, %v2786_v25  ;;  %2147 = vmatpush3.bf16.msra.mxu1 %v2144_v23  ;;  %v77_v25 = vld [vmem:[%s3039_s4 + $0x28] sm:$0xff]  ;;  %v1323_v23 = vld [vmem:[%s3040_s6 + $0x38] sm:$0xff] }
 0x46d   :  { %2035 = vmatmul.mubr.msk.f32.gmra.mrb[18].mxu1 %vm220_vm2, %v2795_v26  ;;  %v2148_v26 = vpack.c.bf16 %v77_v25, %v76_v24 }
 0x46e   :  { %2037 = vmatprep.mubr.msk.f32.mxu1 %vm220_vm2, %v2800_v27  ;;  %v78_v27 = vld [vmem:[%s3039_s4 + $0x30] sm:$0xff] }
 0x46f   :  { %2149 = vmatprep.subr.bf16.mxu1 %v2148_v26 }
 0x470   :  { %2151 = vmatpush3.bf16.msra.mxu1 %v2148_v26  ;;  %v1322_v26 = vld [vmem:[%s3040_s6 + $0x30] sm:$0xff] }
 0x471   :  { %2038 = vmatmul.mubr.msk.f32.gmra.mrb[20].mxu1 %vm220_vm2, %v2809_v28  ;;  %v79_v28 = vld [vmem:[%s3039_s4 + $0x38] sm:$0xff] }
 0x472   :  { %v2152_v42 = vpack.c.bf16 %v79_v28, %v78_v27 }
 0x474   :  { %2153 = vmatprep.subr.bf16.mxu1 %v2152_v42 }
 0x475   :  { %2155 = vmatpush3.bf16.msra.mxu1 %v2152_v42 }
 0x476   :  { %2157 = vmatprep.subr.bf16.mxu1 %v2156_v63 }
 0x479   :  { %2159 = vmatpush3.bf16.msra.mxu1 %v2156_v63 }
 0x47a   :  { %2161 = vmatprep.subr.bf16.mxu1 %v2160_v7 }
 0x47d   :  { %2163 = vmatpush3.bf16.msra.mxu1 %v2160_v7 }
 0x47e   :  { %2165 = vmatprep.subr.bf16.mxu1 %v2164_v14 }
 0x481   :  { %2167 = vmatpush3.bf16.msra.mxu1 %v2164_v14 }
 0x482   :  { %2169 = vmatprep.subr.bf16.mxu1 %v2168_v46 }
 0x485   :  { %2171 = vmatpush3.bf16.msra.mxu1 %v2168_v46 }
 0x486   :  { %2172 = vmatprep.subr.bf16.mxu1 %v2351_v30 }
 0x530   :  { %v2024_v31 = vpop.f32.mrb[10].mxu1 }
 0x531   :  { %v1263_v33 = vadd.f32 %v2024_v31, %v2680_v4  ;;  %v1257_v35 = vpop.f32.mrb[11].mxu1  ;;  %v1318_v4 = vld [vmem:[%s3040_s6 + $0x10] sm:$0xff] }
 0x532   :  { %v1258_v38 = vadd.f32 %v1257_v35, %v2682_v5 }
 0x533   :  { %v1329_v39 = vadd.f32 %v1317_v48, %v1263_v33 }
 0x534   :  { %v1328_v40 = vadd.f32 %v1316_v36, %v1258_v38  ;;  %v2027_v43 = vpop.f32.mrb[12].mxu1 }
 0x535   :  { %v1799_v45 = vmul.f32 -1.442695, %v1329_v39  ;;  %v1273_v47 = vadd.f32 %v2027_v43, %v2684_v8  ;;  %v1267_v61 = vpop.f32.mrb[13].mxu1  ;;  %v1325_v43 = vld [vmem:[%s3040_s6 + $0x48] sm:$0xff] }
 0x536   :  { %v1798_v49 = vmul.f32 -1.442695, %v1328_v40  ;;  %v1268_v2 = vadd.f32 %v1267_v61, %v2686_v9  ;;  %v1324_v61 = vld [vmem:[%s3040_s6 + $0x40] sm:$0xff] }
 0x537   :  { %2306 = vpow2.f32 %v1799_v45  ;;  %v1331_v5 = vadd.f32 %v1319_v44, %v1273_v47 }
 0x538   :  { %2308 = vpow2.f32 %v1798_v49  ;;  %v1330_v52 = vadd.f32 %v1318_v4, %v1268_v2  ;;  %v2030_v53 = vpop.f32.mrb[14].mxu1 }
 0x539   :  { %v1801_v56 = vmul.f32 -1.442695, %v1331_v5  ;;  %v1283_v8 = vadd.f32 %v2030_v53, %v2688_v12  ;;  %v1277_v57 = vpop.f32.mrb[15].mxu1 }
 0x53a   :  { %v1800_v19 = vmul.f32 -1.442695, %v1330_v52  ;;  %v1278_v9 = vadd.f32 %v1277_v57, %v2690_v13  ;;  %v1326_v57 = vld [vmem:[%s3040_s6 + $0x50] sm:$0xff] }
 0x53b   :  { %2310 = vpow2.f32 %v1801_v56  ;;  %v1357_v20 = vadd.f32 %v1321_v16, %v1283_v8 }
 0x53c   :  { %2312 = vpow2.f32 %v1800_v19  ;;  %v1356_v21 = vadd.f32 %v1320_v18, %v1278_v9  ;;  %v2033_v22 = vpop.f32.mrb[16].mxu1 }
 0x53d   :  { %v1803_v24 = vmul.f32 -1.442695, %v1357_v20  ;;  %v1293_v12 = vadd.f32 %v2033_v22, %v2696_v34  ;;  %v1287_v25 = vpop.f32.mrb[17].mxu1 }
 0x53e   :  { %v1802_v27 = vmul.f32 -1.442695, %v1356_v21  ;;  %v1288_v13 = vadd.f32 %v1287_v25, %v2698_v37 }
 0x53f   :  { %2314 = vpow2.f32 %v1803_v24  ;;  %v1359_v28 = vadd.f32 %v1323_v23, %v1293_v12 }
 0x540   :  { %2316 = vpow2.f32 %v1802_v27  ;;  %v1358_v42 = vadd.f32 %v1322_v26, %v1288_v13  ;;  %v2036_v59 = vpop.f32.mrb[18].mxu1  ;;  %v88_v27 = vld [vmem:[%s3039_s4 + $0x80] sm:$0xff]  ;;  %v89_v13 = vld [vmem:[%s3039_s4 + $0x88] sm:$0xff] }
 0x541   :  { %v2307_v62 = vpop.eup %2306  ;;  %v1805_v63 = vmul.f32 -1.442695, %v1359_v28  ;;  %v1297_v58 = vpop.f32.mrb[19].mxu1  ;;  %v1303_v38 = vadd.f32 %v2036_v59, %v2704_v1 }
 0x542   :  { %v2309_v6 = vpop.eup %2308  ;;  %v1345_v7 = vadd.f32 1.0, %v2307_v62  ;;  %v1804_v10 = vmul.f32 -1.442695, %v1358_v42  ;;  %v1298_v44 = vadd.f32 %v1297_v58, %v2706_v3  ;;  %v1327_v3 = vld [vmem:[%s3040_s6 + $0x58] sm:$0xff] }
 0x543   :  { %v1344_v34 = vadd.f32 1.0, %v2309_v6  ;;  %2318 = vpow2.f32 %v1805_v63 }
 0x544   :  { %2320 = vrcp.f32 %v1345_v7  ;;  %v2039_v60 = vpop.f32.mrb[20].mxu1 }
 0x545   :  { %v2311_v11 = vpop.eup %2310  ;;  %2322 = vrcp.f32 %v1344_v34  ;;  %v1307_v14 = vpop.f32.mrb[21].mxu1  ;;  %v1313_v5 = vadd.f32 %v2039_v60, %v2710_v29 }
 0x546   :  { %v2313_v17 = vpop.eup %2312  ;;  %v1347_v37 = vadd.f32 1.0, %v2311_v11  ;;  %2324 = vpow2.f32 %v1804_v10  ;;  %v1308_v16 = vadd.f32 %v1307_v14, %v2712_v32  ;;  %v2173_v10 = vpack.c.bf16 %v89_v13, %v88_v27  ;;  %v90_v14 = vld [vmem:[%s3039_s4 + $0x90] sm:$0xff] }
 0x547   :  { %v1346_v46 = vadd.f32 1.0, %v2313_v17 }
 0x548   :  { %2326 = vrcp.f32 %v1347_v37 }
 0x549   :  { %v2315_v31 = vpop.eup %2314  ;;  %2328 = vrcp.f32 %v1346_v46 }
 0x54a   :  { %v2317_v48 = vpop.eup %2316  ;;  %v1373_v33 = vadd.f32 1.0, %v2315_v31 }
 0x54b   :  { %v1372_v36 = vadd.f32 1.0, %v2317_v48  ;;  %v94_v48 = vld [vmem:[%s3039_s4 + $0xb0] sm:$0xff] }
 0x54c   :  { %2330 = vrcp.f32 %v1373_v33  ;;  %v95_v33 = vld [vmem:[%s3039_s4 + $0xb8] sm:$0xff] }
 0x54d   :  { %v2319_v35 = vpop.eup %2318  ;;  %2332 = vrcp.f32 %v1372_v36  ;;  %v1498_v36 = vrot.slane %v2547_v54, 7  ;;  %v47_v54 = vld [vmem:[%s3038_s2 + $0x60] sm:$0xf]  ;;  %s2354_s2 = smov 48  }
 0x54e   :  { %v2321_v39 = vpop.eup %2320  ;;  %v1375_v40 = vadd.f32 1.0, %v2319_v35  ;;  %v2182_v35 = vpack.c.bf16 %v95_v33, %v94_v48 }
 0x54f   :  { %v2323_v45 = vpop.eup %2322  ;;  %v1385_v47 = vmul.f32 %v2321_v39, %v1303_v38 }
 0x550   :  { %v2325_v4 = vpop.eup %2324  ;;  %v1384_v49 = vmul.f32 %v2323_v45, %v1298_v44  ;;  %2334 = vrcp.f32 %v1375_v40 }
 0x551   :  { %v1374_v2 = vadd.f32 1.0, %v2325_v4  ;;  %v1389_v1 = vadd.f32 %v1385_v47, %v1325_v43  ;;  %v96_v4 = vld [vmem:[%s3039_s4 + $0xc0] sm:$0xf] }
 0x552   :  { %v2327_v52 = vpop.eup %2326  ;;  %v1388_v53 = vadd.f32 %v1384_v49, %v1324_v61 }
 0x553   :  { %v2329_v56 = vpop.eup %2328  ;;  %2336 = vrcp.f32 %v1374_v2  ;;  %v1387_v8 = vmul.f32 %v2327_v52, %v1313_v5 }
 0x554   :  { %2338 = vtanh.f32 %v1389_v1  ;;  %v1386_v18 = vmul.f32 %v2329_v56, %v1308_v16 }
 0x555   :  { %2340 = vtanh.f32 %v1388_v53  ;;  %v1391_v29 = vadd.f32 %v1387_v8, %v1327_v3 }
 0x556   :  { %v1390_v19 = vadd.f32 %v1386_v18, %v1326_v57  ;;  %v2331_v9 = vpop.eup %2330 }
 0x557   :  { %2342 = vtanh.f32 %v1391_v29  ;;  %v2333_v20 = vpop.eup %2332  ;;  %v1397_v23 = vsub.f32 1.0, %v2331_v9  ;;  %v1405_v26 = vmul.f32 %v2331_v9, %v2838_v51 }
 0x558   :  { %2344 = vtanh.f32 %v1390_v19  ;;  %v1396_v24 = vsub.f32 1.0, %v2333_v20  ;;  %v1404_v42 = vmul.f32 %v2333_v20, %v2841_v15  ;;  %v91_v15 = vld [vmem:[%s3039_s4 + $0x98] sm:$0xff] }
 0x559   :  { %v2176_v46 = vpack.c.bf16 %v91_v15, %v90_v14 }
 0x55a   :  { %v2335_v21 = vpop.eup %2334 }
 0x55b   :  { %v1399_v59 = vsub.f32 1.0, %v2335_v21  ;;  %v1407_v51 = vmul.f32 %v2335_v21, %v2846_v55  ;;  %v92_v55 = vld [vmem:[%s3039_s4 + $0xa0] sm:$0xff] }
 0x55d   :  { %v2337_v22 = vpop.eup %2336 }
 0x55e   :  { %v2339_v32 = vpop.eup %2338  ;;  %v1398_v58 = vsub.f32 1.0, %v2337_v22  ;;  %v1406_v11 = vmul.f32 %v2337_v22, %v2849_v41  ;;  %v93_v41 = vld [vmem:[%s3039_s4 + $0xa8] sm:$0xff]  ;;  %s2355_s4 = smov 80  }
 0x55f   :  { %v2341_v12 = vpop.eup %2340  ;;  %v1401_v25 = vmul.f32 %v2339_v32, %v1397_v23  ;;  %v2179_v31 = vpack.c.bf16 %v93_v41, %v92_v55 }
 0x560   :  { %v1400_v28 = vmul.f32 %v2341_v12, %v1396_v24 }
 0x561   :  { %v2343_v62 = vpop.eup %2342  ;;  %v1409_v63 = vadd.f32 %v1405_v26, %v1401_v25 }
 0x562   :  { %v2345_v6 = vpop.eup %2344  ;;  %v1408_v7 = vadd.f32 %v1404_v42, %v1400_v28  ;;  %v1403_v34 = vmul.f32 %v2343_v62, %v1399_v59 }
 0x563   :  { %v1402_v60 = vmul.f32 %v2345_v6, %v1398_v58 }
 0x564   :  { %2072 = vmatprep.mubr.f32.mxu1 %v1408_v7  ;;  %v1411_v17 = vadd.f32 %v1407_v51, %v1403_v34 }
 0x565   :  { %2073 = vmatmul.mubr.f32.vlgmr.msra.gmra.mrb[22].mxu1 %v1409_v63  ;;  %v1410_v37 = vadd.f32 %v1406_v11, %v1402_v60 }
 0x566   :  { %2174 = vmatpush3.bf16.msra.mxu1 %v2173_v10 }
 0x567   :  { %2075 = vmatprep.mubr.f32.mxu1 %v1410_v37  ;;  %2175 = vmatprep.subr.bf16.mxu1 %v2351_v30 }
 0x569   :  { %2076 = vmatmul.mubr.f32.gmra.mrb[24].mxu1 %v1411_v17 }
 0x56a   :  { %2177 = vmatpush3.bf16.msra.mxu1 %v2176_v46  ;;  %2094 = vmatprep.mubr.msk.f32.mxu1 %vm2347_vm1, %v2346_v0 }
 0x56b   :  { %2178 = vmatprep.subr.bf16.mxu1 %v2351_v30 }
 0x56e   :  { %2180 = vmatpush3.bf16.msra.mxu1 %v2179_v31 }
 0x56f   :  { %2181 = vmatprep.subr.bf16.mxu1 %v2351_v30 }
 0x572   :  { %2183 = vmatpush3.bf16.msra.mxu1 %v2182_v35 }
 0x573   :  { %2184 = vmatprep.subr.bf16.mxu1 %v2351_v30 }
 0x575   :  { %2095 = vmatmul.mubr.msk.f32.vlgmr.msra.gmra.mrb[26].mxu1 %vm524_vm3, %v1498_v36 }
 0x576   :  { %2105 = vmatprep.mubr.msk.f32.mxu1 %vm2347_vm1, %v2346_v0  ;;  %v1646_v0 = vsub.s32 0, %v2543_v50 }
 0x638   :  { %v2074_v38 = vpop.f32.mrb[22].mxu1 }
 0x639   :  { %v1478_v39 = vpop.f32.mrb[23].mxu1 }
 0x63a   :  { %v2185_v40 = vpack.c.bf16 %v2074_v38, %v1478_v39 }
 0x63c   :  { %v2077_v43 = vpop.f32.mrb[24].mxu1  ;;  %2186 = vmatpush3.bf16.msra.mxu1 %v2185_v40 }
 0x63d   :  { %v1488_v44 = vpop.f32.mrb[25].mxu1  ;;  %2187 = vmatprep.subr.bf16.mxu1 %v2351_v30 }
 0x63e   :  { %v2188_v45 = vpack.c.bf16 %v2077_v43, %v1488_v44 }
 0x640   :  { %2189 = vmatpush3.bf16.msra.mxu1 %v2188_v45 }
 0x643   :  { %2106 = vmatmul.mubr.msk.f32.vlgmr.msra.gmra.mrb[28].mxu1 %vm220_vm2, %v47_v54 }
 0x648   :  { %v1567_v47 = vpop.f32.mrb[26].mxu1 }
 0x649   :  { %v2096_v61 = vpop.f32.mrb[27].mxu1  ;;  %v1647_v2 = vrot.slane %v1567_v47, %v1646_v0 }
 0x716   :  { %v1640_v49 = vpop.f32.mrb[28].mxu1 }
 0x717   :  { %v1641_v1 = vadd.f32 %v1640_v49, %v96_v4  ;;  %v2107_v30 = vpop.f32.mrb[29].mxu1 }
 0x719   :  { %v1648_v5 = vadd.f32 %v1647_v2, %v1641_v1 }
 0x71b   :  { %1696 = vrot.lane.b32.xlu1 %v1648_v5, %s2352_s13  ;;  %1686 = vrot.lane.b32.xlu0 %v1648_v5, %s2353_s14  ;;  %v1654_v52 = vrot.slane %v1648_v5, 2  ;;  %v1658_v53 = vrot.slane %v1648_v5, 3  ;;  %v1650_v3 = vrot.slane %v1648_v5, 1 }
 0x71f   :  { %1662 = vrot.lane.b32.xlu0 %v1648_v5, %s2348_s28  ;;  %1690 = vrot.lane.b32.xlu1 %v1654_v52, %s2352_s13 }
 0x723   :  { %1693 = vrot.lane.b32.xlu1 %v1658_v53, %s2348_s28  ;;  %1651 = vrot.lane.b32.xlu0 %v1650_v3, %s2352_s13 }
 0x727   :  { %1699 = vrot.lane.b32.xlu1 %v1650_v3, %s2348_s28  ;;  %1655 = vrot.lane.b32.xlu0 %v1654_v52, %s2348_s28 }
 0x72b   :  { %1702 = vrot.lane.b32.xlu1 %v1654_v52, %s2354_s2  ;;  %1659 = vrot.lane.b32.xlu0 %v1658_v53, %s2354_s2 }
 0x72f   :  { %1705 = vrot.lane.b32.xlu1 %v1658_v53, %s2350_s12  ;;  %1665 = vrot.lane.b32.xlu0 %v1650_v3, %s2354_s2 }
 0x733   :  { %1671 = vrot.lane.b32.xlu1 %v1658_v53, %s2355_s4  ;;  %1668 = vrot.lane.b32.xlu0 %v1654_v52, %s2350_s12 }
 0x78d   :  { %v1697_v50 = vpop.permute.xlu1 %1696  ;;  %v1687_v16 = vpop.permute.xlu0 %1686 }
 0x78e   :  { %v1708_v9 = vsel %vm1674_vm4, %v1687_v16, %v1650_v3 }
 0x791   :  { %v1663_v56 = vpop.permute.xlu0 %1662  ;;  %v1691_v8 = vpop.permute.xlu1 %1690 }
 0x792   :  { %v1709_v20 = vsel %vm220_vm2, %v1708_v9, %v1691_v8 }
 0x795   :  { %v1694_v57 = vpop.permute.xlu1 %1693  ;;  %v1652_v18 = vpop.permute.xlu0 %1651 }
 0x796   :  { %v1710_v21 = vsel %vm1677_vm5, %v1709_v20, %v1694_v57  ;;  %v1675_v32 = vsel %vm1674_vm4, %v1648_v5, %v1652_v18 }
 0x797   :  { %v1711_v24 = vsel %vm524_vm3, %v1710_v21, %v1697_v50 }
 0x799   :  { %v1700_v29 = vpop.permute.xlu1 %1699  ;;  %v1656_v19 = vpop.permute.xlu0 %1655 }
 0x79a   :  { %v1676_v12 = vsel %vm220_vm2, %v1675_v32, %v1656_v19  ;;  %v1712_v25 = vsel %vm1680_vm6, %v1711_v24, %v1700_v29 }
 0x79d   :  { %v1703_v22 = vpop.permute.xlu1 %1702  ;;  %v1660_v23 = vpop.permute.xlu0 %1659 }
 0x79e   :  { %v1678_v26 = vsel %vm1677_vm5, %v1676_v12, %v1660_v23  ;;  %v1713_v28 = vsel %vm1682_vm7, %v1712_v25, %v1703_v22 }
 0x79f   :  { %v1679_v59 = vsel %vm524_vm3, %v1678_v26, %v1663_v56 }
 0x7a1   :  { %v1706_v27 = vpop.permute.xlu1 %1705  ;;  %v1666_v13 = vpop.permute.xlu0 %1665 }
 0x7a2   :  { %v1714_v42 = vsel %vm1684_vm8, %v1713_v28, %v1706_v27  ;;  %v1681_v62 = vsel %vm1680_vm6, %v1679_v59, %v1666_v13 }
 0x7a3   :  { %v1716_v6 = vrot.slane %v1714_v42, 7 }
 0x7a5   :  { %v1672_v63 = vpop.permute.xlu1 %1671  ;;  %v1669_v58 = vpop.permute.xlu0 %1668 }
 0x7a6   :  { %v1683_v7 = vsel %vm1682_vm7, %v1681_v62, %v1669_v58 }
 0x7a7   :  { %v1685_v10 = vsel %vm1684_vm8, %v1683_v7, %v1672_v63 }
 0x7a8   :  { %v1719_v34 = vsel %vm1718_vm9, %v1685_v10, %v1716_v6 }
 0x7a9   :  { %1720 = vst [vmem:[%s3041_s7] sm:$0x3] %v1719_v34 }

</bundles_post_ra>
